<compile_context>
chip_gen: v7x
topology: tpu7x:2x2x1
jax: 0.10.0
libtpu: 0.0.40
codegen_flags: <defaults>
</compile_context>

<pallas_src>
import functools

import jax
import jax.numpy as jnp
from jax.experimental import pallas as pl
from jax.experimental.pallas import tpu as pltpu


def mlp_kernel(x_ref,             # (2, tb)      inputs, batch on lanes
               w1_ref, b1_ref,    # (128, 2),   (128, 1)   f32
               w2_ref, b2_ref,    # (128, 128) compute_dtype, (128, 1) f32
               w3_ref, b3_ref,    # (128, 128) compute_dtype, (128, 1) f32
               w4_ref, b4_ref,    # (128, 128) compute_dtype, (128, 1) f32
               w5_ref, b5_ref,    # (128, 1),   (1, 1)      f32
               o_ref,             # (1, tb)     lane-dense output
               *, compute_dtype):
    x = x_ref[...]

    # Layer 1: K=2 would waste the MXU -> two VPU broadcast-FMAs instead.
    h = jnp.tanh(w1_ref[:, 0:1] * x[0:1, :]
                 + w1_ref[:, 1:2] * x[1:2, :]
                 + b1_ref[...])                                    # (128, tb) f32

    # Layers 2-4: real MXU matmuls, (128,128) @ (128, tb), f32 accumulation.
    # Weights arrive already in compute_dtype; only the activations are cast
    # per layer (unavoidable, and cheap on the VPU relative to the matmul).
    for w_ref, b_ref in ((w2_ref, b2_ref), (w3_ref, b3_ref), (w4_ref, b4_ref)):
        h = jnp.tanh(
            jnp.dot(w_ref[...],
                    h.astype(compute_dtype),
                    preferred_element_type=jnp.float32)
            + b_ref[...])                                          # (128, tb) f32

    # Layer 5: N=1 would use a single MXU output column -> VPU mul + XLU
    # sublane reduction; the result is naturally (1, tb) lane-dense.
    out = jnp.sum(w5_ref[...] * h, axis=0, keepdims=True) + b5_ref[...]
    o_ref[...] = out.astype(o_ref.dtype)


def _pick_batch_tile(B):
    # Lane-aligned tiles (multiple of 128) with >=2 grid steps so the pipeline
    # has something to overlap (and both v7x TensorCores get work). Capped at
    # 2048 columns: the live (128, tb) f32 activations plus the double-buffered
    # (2, tb) x tile stay far below the 32 MiB scoped VMEM default (which also
    # leaves plenty of headroom on v7x's 64 MiB physical VMEM).
    for cand in (2048, 1024, 512, 256, 128):
        if B % cand == 0 and B // cand >= 2:
            return cand
    return B  # small / ragged batch: single grid step, block == full extent


def mlp_forward(x, params, *, tb=None, compute_dtype=jnp.float32):
    """x: (B, 2) float32. params: PyTorch-layout weights (see init_params)."""
    B, f_in = x.shape
    assert f_in == 2
    if tb is None:
        tb = _pick_batch_tile(B)
    assert B % tb == 0
    num_tiles = B // tb

    x_t = x.T  # (2, B): put the batch dimension on the lane axis

    # Pre-cast the MXU weights once on the host side (keeps the kernel free of
    # per-grid-step weight casts and halves their VMEM footprint for bf16).
    w2 = params["w2"].astype(compute_dtype)
    w3 = params["w3"].astype(compute_dtype)
    w4 = params["w4"].astype(compute_dtype)

    def resident(arr):
        # Small weights/biases: full array resident at every grid step
        # (constant index_map -> fetched once by the pipeline).
        # TODO(synk): pipeline_mode=pl.Buffered(1) would single-buffer these and
        # save ~200 KiB of VMEM; skipped for broad lowering compatibility.
        n = arr.ndim
        return pl.BlockSpec(arr.shape, lambda i, n=n: (0,) * n)

    in_specs = [
        pl.BlockSpec((2, tb), lambda i: (0, i)),          # x tile
        resident(params["w1"]), resident(params["b1"]),
        resident(w2), resident(params["b2"]),
        resident(w3), resident(params["b3"]),
        resident(w4), resident(params["b4"]),
        resident(params["w5"]), resident(params["b5"]),
    ]
    # Lane-dense output: (1, B) with (1, tb) blocks -> unmasked vector stores.
    out_spec = pl.BlockSpec((1, tb), lambda i: (0, i))

    flops = 2 * B * (2 * 128 + 3 * 128 * 128 + 128)
    transcendentals = 4 * B * 128
    bytes_accessed = (B * 2 * 4 + B * 4
                      + 4 * (128 * 2 + 3 * 128 * 128 + 128 + 4 * 128 + 1))

    out = pl.pallas_call(
        functools.partial(mlp_kernel, compute_dtype=compute_dtype),
        out_shape=jax.ShapeDtypeStruct((1, B), x.dtype),
        grid_spec=pltpu.PrefetchScalarGridSpec(
            num_scalar_prefetch=0,
            grid=(num_tiles,),
            in_specs=in_specs,
            out_specs=out_spec,
        ),
        compiler_params=pltpu.CompilerParams(
            dimension_semantics=("parallel",)),
        cost_estimate=pl.CostEstimate(
            flops=flops,
            transcendentals=transcendentals,
            bytes_accessed=bytes_accessed),
    )(x_t,
      params["w1"], params["b1"],
      w2, params["b2"],
      w3, params["b3"],
      w4, params["b4"],
      params["w5"], params["b5"])

    # (1, B) and (B, 1) share the same row-major layout -> free reshape.
    return out.reshape(B, 1)


def init_params(key):
    """PyTorch nn.Linear default init: U(-1/sqrt(fan_in), +1/sqrt(fan_in)).
    Weights stored (out_features, in_features); biases as (out_features, 1).
    The last layer is stored transposed (w5: (128,1), b5: (1,1)) so the kernel
    needs no in-kernel transpose for its VPU/XLU final layer."""
    dims = [(2, 128), (128, 128), (128, 128), (128, 128), (128, 1)]
    params = {}
    for idx, (fan_in, fan_out) in enumerate(dims, start=1):
        key, kw, kb = jax.random.split(key, 3)
        bound = 1.0 / jnp.sqrt(jnp.float32(fan_in))
        params[f"w{idx}"] = jax.random.uniform(
            kw, (fan_out, fan_in), jnp.float32, -bound, bound)
        params[f"b{idx}"] = jax.random.uniform(
            kb, (fan_out, 1), jnp.float32, -bound, bound)
    params["w5"] = params["w5"].T                 # (128, 1)
    params["b5"] = params["b5"].reshape(1, 1)     # (1, 1)
    return params


def mlp_reference(x, params):
    h = jnp.tanh(x @ params["w1"].T + params["b1"].T)
    h = jnp.tanh(h @ params["w2"].T + params["b2"].T)
    h = jnp.tanh(h @ params["w3"].T + params["b3"].T)
    h = jnp.tanh(h @ params["w4"].T + params["b4"].T)
    return h @ params["w5"] + params["b5"]


if __name__ == "__main__":
    key = jax.random.PRNGKey(0)
    key, kx = jax.random.split(key)
    B = 512  # small, but enough for 2 lane-aligned (tb=256) batch tiles
    x = jax.random.normal(kx, (B, 2), jnp.float32)
    params = init_params(key)

    ref = mlp_reference(x, params)

    # Full-f32 matmuls: tight check.
    out = jax.block_until_ready(mlp_forward(x, params))
    assert out.shape == (B, 1)
    assert jnp.allclose(out, ref, atol=1e-4, rtol=1e-4)

    # bf16 MXU operands with f32 accumulation (fast path on v6e/v7x): looser check.
    out_bf16 = jax.block_until_ready(
        mlp_forward(x, params, compute_dtype=jnp.bfloat16))
    assert out_bf16.shape == (B, 1)
    assert jnp.allclose(out_bf16, ref, atol=5e-2, rtol=5e-2)

    print("KERNEL_OK")
</pallas_src>

<mosaic_0001>
module attributes {stable_mosaic.version = 11 : i64} {
  func.func @mlp_kernel(%arg0: i32, %arg1: memref<2x256xf32, #tpu.memory_space<vmem>>, %arg2: memref<128x2xf32, #tpu.memory_space<vmem>>, %arg3: memref<128x1xf32, #tpu.memory_space<vmem>>, %arg4: memref<128x128xf32, #tpu.memory_space<vmem>>, %arg5: memref<128x1xf32, #tpu.memory_space<vmem>>, %arg6: memref<128x128xf32, #tpu.memory_space<vmem>>, %arg7: memref<128x1xf32, #tpu.memory_space<vmem>>, %arg8: memref<128x128xf32, #tpu.memory_space<vmem>>, %arg9: memref<128x1xf32, #tpu.memory_space<vmem>>, %arg10: memref<128x1xf32, #tpu.memory_space<vmem>>, %arg11: memref<1x1xf32, #tpu.memory_space<vmem>>, %arg12: memref<1x256xf32, #tpu.memory_space<vmem>>) attributes {dimension_semantics = [#tpu.dimension_semantics<parallel>], iteration_bounds = array<i64: 2>, scalar_prefetch = 0 : i64, scratch_operands = 0 : i64, tpu.core_type = #tpu.core_type<tc>, window_params = [{transform_indices = @transform_0, window_bounds = array<i64: 2, 256>}, {pipeline_mode = #tpu.pipeline_mode<synchronous>, transform_indices = @transform_1, window_bounds = array<i64: 128, 2>}, {pipeline_mode = #tpu.pipeline_mode<synchronous>, transform_indices = @transform_2, window_bounds = array<i64: 128, 1>}, {pipeline_mode = #tpu.pipeline_mode<synchronous>, transform_indices = @transform_3, window_bounds = array<i64: 128, 128>}, {pipeline_mode = #tpu.pipeline_mode<synchronous>, transform_indices = @transform_4, window_bounds = array<i64: 128, 1>}, {pipeline_mode = #tpu.pipeline_mode<synchronous>, transform_indices = @transform_5, window_bounds = array<i64: 128, 128>}, {pipeline_mode = #tpu.pipeline_mode<synchronous>, transform_indices = @transform_6, window_bounds = array<i64: 128, 1>}, {pipeline_mode = #tpu.pipeline_mode<synchronous>, transform_indices = @transform_7, window_bounds = array<i64: 128, 128>}, {pipeline_mode = #tpu.pipeline_mode<synchronous>, transform_indices = @transform_8, window_bounds = array<i64: 128, 1>}, {pipeline_mode = #tpu.pipeline_mode<synchronous>, transform_indices = @transform_9, window_bounds = array<i64: 128, 1>}, {pipeline_mode = #tpu.pipeline_mode<synchronous>, transform_indices = @transform_10, window_bounds = array<i64: 1, 1>}, {transform_indices = @transform_11, window_bounds = array<i64: 1, 256>}]} {
    %c0 = arith.constant 0 : index
    %c0_0 = arith.constant 0 : index
    %0 = vector.load %arg1[%c0, %c0_0] : memref<2x256xf32, #tpu.memory_space<vmem>>, vector<2x256xf32>
    %c0_1 = arith.constant 0 : index
    %c0_2 = arith.constant 0 : index
    %1 = vector.load %arg2[%c0_1, %c0_2] : memref<128x2xf32, #tpu.memory_space<vmem>>, vector<128x1xf32>
    %2 = vector.extract_strided_slice %0 {offsets = [0, 0], sizes = [1, 256], strides = [1, 1]} : vector<2x256xf32> to vector<1x256xf32>
    %3 = vector.broadcast %1 : vector<128x1xf32> to vector<128x256xf32>
    %4 = vector.broadcast %2 : vector<1x256xf32> to vector<128x256xf32>
    %5 = arith.mulf %3, %4 : vector<128x256xf32>
    %c0_3 = arith.constant 0 : index
    %c1 = arith.constant 1 : index
    %6 = vector.load %arg2[%c0_3, %c1] : memref<128x2xf32, #tpu.memory_space<vmem>>, vector<128x1xf32>
    %7 = vector.extract_strided_slice %0 {offsets = [1, 0], sizes = [1, 256], strides = [1, 1]} : vector<2x256xf32> to vector<1x256xf32>
    %8 = vector.broadcast %6 : vector<128x1xf32> to vector<128x256xf32>
    %9 = vector.broadcast %7 : vector<1x256xf32> to vector<128x256xf32>
    %10 = arith.mulf %8, %9 : vector<128x256xf32>
    %11 = arith.addf %5, %10 : vector<128x256xf32>
    %c0_4 = arith.constant 0 : index
    %c0_5 = arith.constant 0 : index
    %12 = vector.load %arg3[%c0_4, %c0_5] : memref<128x1xf32, #tpu.memory_space<vmem>>, vector<128x1xf32>
    %13 = vector.broadcast %12 : vector<128x1xf32> to vector<128x256xf32>
    %14 = arith.addf %11, %13 : vector<128x256xf32>
    %15 = math.tanh %14 : vector<128x256xf32>
    %c0_6 = arith.constant 0 : index
    %c0_7 = arith.constant 0 : index
    %16 = vector.load %arg4[%c0_6, %c0_7] : memref<128x128xf32, #tpu.memory_space<vmem>>, vector<128x128xf32>
    %cst = arith.constant dense<0.000000e+00> : vector<128x256xf32>
    %17 = tpu.matmul %16, %15, %cst {dimension_numbers = #tpu.dot_dimension_numbers<[1], [0], [0], [1], [0, 0, 1, 1], [], []>} : vector<128x128xf32>, vector<128x256xf32>, vector<128x256xf32> -> vector<128x256xf32>
    %c0_8 = arith.constant 0 : index
    %c0_9 = arith.constant 0 : index
    %18 = vector.load %arg5[%c0_8, %c0_9] : memref<128x1xf32, #tpu.memory_space<vmem>>, vector<128x1xf32>
    %19 = vector.broadcast %18 : vector<128x1xf32> to vector<128x256xf32>
    %20 = arith.addf %17, %19 : vector<128x256xf32>
    %21 = math.tanh %20 : vector<128x256xf32>
    %c0_10 = arith.constant 0 : index
    %c0_11 = arith.constant 0 : index
    %22 = vector.load %arg6[%c0_10, %c0_11] : memref<128x128xf32, #tpu.memory_space<vmem>>, vector<128x128xf32>
    %cst_12 = arith.constant dense<0.000000e+00> : vector<128x256xf32>
    %23 = tpu.matmul %22, %21, %cst_12 {dimension_numbers = #tpu.dot_dimension_numbers<[1], [0], [0], [1], [0, 0, 1, 1], [], []>} : vector<128x128xf32>, vector<128x256xf32>, vector<128x256xf32> -> vector<128x256xf32>
    %c0_13 = arith.constant 0 : index
    %c0_14 = arith.constant 0 : index
    %24 = vector.load %arg7[%c0_13, %c0_14] : memref<128x1xf32, #tpu.memory_space<vmem>>, vector<128x1xf32>
    %25 = vector.broadcast %24 : vector<128x1xf32> to vector<128x256xf32>
    %26 = arith.addf %23, %25 : vector<128x256xf32>
    %27 = math.tanh %26 : vector<128x256xf32>
    %c0_15 = arith.constant 0 : index
    %c0_16 = arith.constant 0 : index
    %28 = vector.load %arg8[%c0_15, %c0_16] : memref<128x128xf32, #tpu.memory_space<vmem>>, vector<128x128xf32>
    %cst_17 = arith.constant dense<0.000000e+00> : vector<128x256xf32>
    %29 = tpu.matmul %28, %27, %cst_17 {dimension_numbers = #tpu.dot_dimension_numbers<[1], [0], [0], [1], [0, 0, 1, 1], [], []>} : vector<128x128xf32>, vector<128x256xf32>, vector<128x256xf32> -> vector<128x256xf32>
    %c0_18 = arith.constant 0 : index
    %c0_19 = arith.constant 0 : index
    %30 = vector.load %arg9[%c0_18, %c0_19] : memref<128x1xf32, #tpu.memory_space<vmem>>, vector<128x1xf32>
    %31 = vector.broadcast %30 : vector<128x1xf32> to vector<128x256xf32>
    %32 = arith.addf %29, %31 : vector<128x256xf32>
    %33 = math.tanh %32 : vector<128x256xf32>
    %c0_20 = arith.constant 0 : index
    %c0_21 = arith.constant 0 : index
    %34 = vector.load %arg10[%c0_20, %c0_21] : memref<128x1xf32, #tpu.memory_space<vmem>>, vector<128x1xf32>
    %35 = vector.broadcast %34 : vector<128x1xf32> to vector<128x256xf32>
    %36 = arith.mulf %35, %33 : vector<128x256xf32>
    %cst_22 = arith.constant dense<0.000000e+00> : vector<256xf32>
    %37 = vector.multi_reduction <add>, %36, %cst_22 [0] : vector<128x256xf32> to vector<256xf32>
    %38 = vector.shape_cast %37 : vector<256xf32> to vector<1x256xf32>
    %c0_23 = arith.constant 0 : index
    %c0_24 = arith.constant 0 : index
    %39 = vector.load %arg11[%c0_23, %c0_24] : memref<1x1xf32, #tpu.memory_space<vmem>>, vector<1x1xf32>
    %40 = vector.broadcast %39 : vector<1x1xf32> to vector<1x256xf32>
    %41 = arith.addf %38, %40 : vector<1x256xf32>
    %c0_25 = arith.constant 0 : index
    %c0_26 = arith.constant 0 : index
    %42 = vector.load %arg12[%c0_25, %c0_26] : memref<1x256xf32, #tpu.memory_space<vmem>>, vector<1x256xf32>
    tpu.vector_store %arg12[%c0_25, %c0_26], %41 {strides = array<i32>} : memref<1x256xf32, #tpu.memory_space<vmem>>, vector<1x256xf32>,
    return
  }
  func.func @transform_0(%arg0: i32) -> (i32, i32) {
    %c0_i32 = arith.constant 0 : i32
    %c0_i32_0 = arith.constant 0 : i32
    return %c0_i32, %arg0 : i32, i32
  }
  func.func @transform_1(%arg0: i32) -> (i32, i32) {
    %c0_i32 = arith.constant 0 : i32
    %c0_i32_0 = arith.constant 0 : i32
    %c0_i32_1 = arith.constant 0 : i32
    return %c0_i32, %c0_i32_0 : i32, i32
  }
  func.func @transform_2(%arg0: i32) -> (i32, i32) {
    %c0_i32 = arith.constant 0 : i32
    %c0_i32_0 = arith.constant 0 : i32
    %c0_i32_1 = arith.constant 0 : i32
    return %c0_i32, %c0_i32_0 : i32, i32
  }
  func.func @transform_3(%arg0: i32) -> (i32, i32) {
    %c0_i32 = arith.constant 0 : i32
    %c0_i32_0 = arith.constant 0 : i32
    %c0_i32_1 = arith.constant 0 : i32
    return %c0_i32, %c0_i32_0 : i32, i32
  }
  func.func @transform_4(%arg0: i32) -> (i32, i32) {
    %c0_i32 = arith.constant 0 : i32
    %c0_i32_0 = arith.constant 0 : i32
    %c0_i32_1 = arith.constant 0 : i32
    return %c0_i32, %c0_i32_0 : i32, i32
  }
  func.func @transform_5(%arg0: i32) -> (i32, i32) {
    %c0_i32 = arith.constant 0 : i32
    %c0_i32_0 = arith.constant 0 : i32
    %c0_i32_1 = arith.constant 0 : i32
    return %c0_i32, %c0_i32_0 : i32, i32
  }
  func.func @transform_6(%arg0: i32) -> (i32, i32) {
    %c0_i32 = arith.constant 0 : i32
    %c0_i32_0 = arith.constant 0 : i32
    %c0_i32_1 = arith.constant 0 : i32
    return %c0_i32, %c0_i32_0 : i32, i32
  }
  func.func @transform_7(%arg0: i32) -> (i32, i32) {
    %c0_i32 = arith.constant 0 : i32
    %c0_i32_0 = arith.constant 0 : i32
    %c0_i32_1 = arith.constant 0 : i32
    return %c0_i32, %c0_i32_0 : i32, i32
  }
  func.func @transform_8(%arg0: i32) -> (i32, i32) {
    %c0_i32 = arith.constant 0 : i32
    %c0_i32_0 = arith.constant 0 : i32
    %c0_i32_1 = arith.constant 0 : i32
    return %c0_i32, %c0_i32_0 : i32, i32
  }
  func.func @transform_9(%arg0: i32) -> (i32, i32) {
    %c0_i32 = arith.constant 0 : i32
    %c0_i32_0 = arith.constant 0 : i32
    %c0_i32_1 = arith.constant 0 : i32
    return %c0_i32, %c0_i32_0 : i32, i32
  }
  func.func @transform_10(%arg0: i32) -> (i32, i32) {
    %c0_i32 = arith.constant 0 : i32
    %c0_i32_0 = arith.constant 0 : i32
    %c0_i32_1 = arith.constant 0 : i32
    return %c0_i32, %c0_i32_0 : i32, i32
  }
  func.func @transform_11(%arg0: i32) -> (i32, i32) {
    %c0_i32 = arith.constant 0 : i32
    %c0_i32_0 = arith.constant 0 : i32
    return %c0_i32, %arg0 : i32, i32
  }
}

</mosaic_0001>

<bundles_post_ra>
// kernel: tpu_custom_call.1
= control target key start
LH: loop header
LB: loop body
LE: loop exit
PB: predicated region body
PF: predicated region fallthrough
CT: control target
= control target key end

     0   :  { %s3444_s0 = inlined_call_operand.vmem [shape: f32[2,512], index: 0, kind: input, shape index: {}]   ;;  %s3445_s1 = inlined_call_operand.vmem [shape: f32[128,2], index: 1, kind: input, shape index: {}]   ;;  %s3446_s2 = inlined_call_operand.vmem [shape: f32[128,1], index: 2, kind: input, shape index: {}]   ;;  %s3447_s3 = inlined_call_operand.vmem [shape: f32[128,128], index: 3, kind: input, shape index: {}]   ;;  %s3448_s4 = inlined_call_operand.vmem [shape: f32[128,1], index: 4, kind: input, shape index: {}]   ;;  %s3449_s5 = inlined_call_operand.vmem [shape: f32[128,128], index: 5, kind: input, shape index: {}]   ;;  %s3450_s6 = inlined_call_operand.vmem [shape: f32[128,1], index: 6, kind: input, shape index: {}]   ;;  %s3451_s7 = inlined_call_operand.vmem [shape: f32[128,128], index: 7, kind: input, shape index: {}]   ;;  %s3452_s8 = inlined_call_operand.vmem [shape: f32[128,1], index: 8, kind: input, shape index: {}]   ;;  %s3453_s9 = inlined_call_operand.vmem [shape: f32[128,1], index: 9, kind: input, shape index: {}]   ;;  %s3454_s10 = inlined_call_operand.<no memory space> [shape: f32[1,1], index: 10, kind: input, shape index: {}]   ;;  %s3455_s11 = inlined_call_operand.hbm [shape: f32[1,512], index: 11, kind: output, shape index: {}]  }
   0x1   :  { %v16_v0 = vstv %s3454_s10 }
   0x2   :  { %17 = vst [vmem:[#allocation2] sm:$0x1] %v16_v0 }
   0x3   :  { %18 = vsyncpa [#allocation4], 0 }
   0x4   :  { %20 = vsyncpa [#allocation4 + $0x1], 0  ;;  %s2612_s19 = smov 0   ;;  %s2614_s20 = smov 0  }
   0x5   :  { %s2616_s21 = smov 0   ;;  %s2618_s22 = smov 0  }
   0x6 LB: > { %s2633_s10 = sadd.s32 4294967295, %s2542_s22   ;;  %s2038_s23 = sadd.s32 4294967294, %s2542_s22   ;;  %s2542_s22 = sphi %s2618_s22, %s3461_s22   ;;  %s2538_s21 = sphi %s2616_s21, %s3460_s21   ;;  %s2534_s20 = sphi %s2614_s20, %s3459_s20   ;;  %s2530_s19 = sphi %s2612_s19, %s3458_s19  }
   0x7   : > { %s2637_s24 = sadd.s32 1, %s2542_s22   ;;  %s269_s25 = sadd.s32 1, %s2538_s21 }
   0x8   : > { %s266_s26 = ssub.s32 %s2542_s22, %s2637_s24  ;;  %p279_p0 = scmp.ne.s32.totalorder %s2538_s21, %s2534_s20 }
   0x9   : > { %p267_p1 = scmp.eq.s32.totalorder %s266_s26, 0  ;;  %p280_p2 = scmp.eq.s32.totalorder %s2633_s10, 1 }
   0xa   : > { %p285_p3 = scmp.ne.s32.totalorder %s2534_s20, %s2530_s19  ;;  %p286_p4 = scmp.eq.s32.totalorder %s2038_s23, 1 }
   0xb   : > { %s2648_s27 = scalar_select %p267_p1, %s2538_s21, %s269_s25  }
   0xc   : > { %p2650_p5 = por %p280_p2, %p279_p0  ;;  %p2654_p6 = por %p286_p4, %p285_p3 }
   0xd   : > { %p2041_p7 = scmp.ge.s32.totalorder %s2542_s22, 1  ;;  %p343_p8 = scmp.lt.s32.totalorder %s2542_s22, 3 }
   0xf   : > { %p344_p9 = pnand %p2041_p7, %p343_p8 }
  0x10   : > { %v393_v1 = vld [vmem:[%s3445_s1 + $0x10] sm:$0xff] (!%p344_p9)  ;;  %v391_v2 = vld [vmem:[%s3445_s1] sm:$0xff] (!%p344_p9)  ;;  %v2544_v3 = vmov (!%p344_p9), 1   ;;  %v392_v5 = vld [vmem:[%s3445_s1 + $0x8] sm:$0xff] (!%p344_p9)  ;;  %v2545_v8 = vmov (!%p344_p9), 0   ;;  %s2043_s23 = sshll.u32 (!%p344_p9), %s2633_s10, 1  ;;  %v488_v62 = vlaneseq (!%p344_p9) }
  0x11   : > { %347 = sbr.rel (%p344_p9) target bundleno = 1195 (0x4ab), region = 64  ;;  %2208 = vset.pattern.permute.xlu0 (!%p344_p9), %v2544_v3  ;;  %2206 = vset.pattern.permute.xlu1 (!%p344_p9), %v2544_v3  ;;  %v395_v4 = vld [vmem:[%s3445_s1 + $0x20] sm:$0xff] (!%p344_p9)  ;;  %v397_v6 = vld [vmem:[%s3445_s1 + $0x30] sm:$0xff] (!%p344_p9)  ;;  %v394_v7 = vld [vmem:[%s3445_s1 + $0x18] sm:$0xff] (!%p344_p9)  ;;  %p384_p10 = scmp.lt.s32.totalorder (!%p344_p9), %s2043_s23, 3 }
  0x12   : > { %547 = vperm.xlu0 (!%p344_p9), %2208, %v393_v1   ;;  %539 = vperm.xlu1 (!%p344_p9), %2206, %v391_v2   ;;  %v399_v9 = vld [vmem:[%s3445_s1 + $0x40] sm:$0xff] (!%p344_p9)  ;;  %v401_v10 = vld [vmem:[%s3445_s1 + $0x50] sm:$0xff] (!%p344_p9)  ;;  %v396_v14 = vld [vmem:[%s3445_s1 + $0x28] sm:$0xff] (!%p344_p9)  ;;  %s2050_s26 = sshll.u32 (!%p344_p9), %s2633_s10, 5  ;;  %vm1961_vm0 = vcmp.lt.s32.totalorder (!%p344_p9), %v488_v62, 256  ;;  %s2548_s10 = smov (!%p344_p9), [#allocation3]  }
  0x13   : > { %v684_v11 = vld [vmem:[%s3446_s2] sm:$0xff] (!%p344_p9)  ;;  %v2701_v13 = vld [vmem:[%s3445_s1 + $0x70] sm:$0xff] (!%p344_p9)  ;;  %v685_v16 = vld [vmem:[%s3446_s2 + $0x8] sm:$0xff] (!%p344_p9)  ;;  %s3402_s15 = scalar_lea.hbm (!%p344_p9), %s3455_s11, %s2050_s26  ;;  %s2484_s18 = sshll.u32 (!%p344_p9), %s2548_s10, 4  ;;  %s2485_s18 = int_to_ptr.vmem [resolvable:$false] %s2484_s18 }
  0x14   : > { %v2694_v12 = vld [vmem:[%s3445_s1 + $0x60] sm:$0xff] (!%p344_p9)  ;;  %v686_v15 = vld [vmem:[%s3446_s2 + $0x10] sm:$0xff] (!%p344_p9)  ;;  %v687_v17 = vld [vmem:[%s3446_s2 + $0x18] sm:$0xff] (!%p344_p9) }
  0x15   : > { %v398_v18 = vld [vmem:[%s3445_s1 + $0x38] sm:$0xff] (!%p344_p9)  ;;  %v689_v19 = vld [vmem:[%s3446_s2 + $0x28] sm:$0xff] (!%p344_p9)  ;;  %v688_v21 = vld [vmem:[%s3446_s2 + $0x20] sm:$0xff] (!%p344_p9) }
  0x16   : > { %555 = vperm.xlu0 (!%p344_p9), %2208, %v395_v4   ;;  %543 = vperm.xlu1 (!%p344_p9), %2206, %v392_v5   ;;  %v691_v20 = vld [vmem:[%s3446_s2 + $0x38] sm:$0xff] (!%p344_p9)  ;;  %v693_v22 = vld [vmem:[%s3446_s2 + $0x48] sm:$0xff] (!%p344_p9)  ;;  %v860_v26 = vld [vmem:[%s3448_s4] sm:$0xff] (!%p344_p9) }
  0x17   : > { %v695_v23 = vld [vmem:[%s3446_s2 + $0x58] sm:$0xff] (!%p344_p9)  ;;  %v400_v24 = vld [vmem:[%s3445_s1 + $0x48] sm:$0xff] (!%p344_p9)  ;;  %v862_v27 = vld [vmem:[%s3448_s4 + $0x10] sm:$0xff] (!%p344_p9) }
  0x18   : > { %v697_v25 = vld [vmem:[%s3446_s2 + $0x68] sm:$0xff]  ;;  %v690_v28 = vld [vmem:[%s3446_s2 + $0x30] sm:$0xff]  ;;  %v864_v29 = vld [vmem:[%s3448_s4 + $0x20] sm:$0xff]  ;;  %s3463_s23 = smov (!%p384_p10, %s2043_s23), 3 }
  0x19   : > { %v866_v30 = vld [vmem:[%s3448_s4 + $0x30] sm:$0xff]  ;;  %v402_v31 = vld [vmem:[%s3445_s1 + $0x58] sm:$0xff]  ;;  %v868_v32 = vld [vmem:[%s3448_s4 + $0x40] sm:$0xff]  ;;  %s2044_s30 = sshll.u32 %s3463_s23, 1  ;;  %s380_s23 = sand.u32 1, %s2534_s20  }
  0x1a   : > { %563 = vperm.xlu0 %2208, %v397_v6   ;;  %2207 = vset.pattern.permute.xlu1 %v2545_v8  ;;  %v870_v33 = vld [vmem:[%s3448_s4 + $0x50] sm:$0xff]  ;;  %v692_v34 = vld [vmem:[%s3446_s2 + $0x40] sm:$0xff]  ;;  %v404_v37 = vld [vmem:[%s3445_s1 + $0x68] sm:$0xff]  ;;  %s387_s16 = scalar_lea.vmem %s3444_s0, %s2044_s30  ;;  %s2042_s25 = sshll.u32 %s380_s23, 1 }
  0x1b   : > { %424 = vperm.xlu1 %2207, %v394_v7   ;;  %v872_v35 = vld [vmem:[%s3448_s4 + $0x60] sm:$0xff]  ;;  %v874_v36 = vld [vmem:[%s3448_s4 + $0x70] sm:$0xff]  ;;  %v406_v44 = vld [vmem:[%s3445_s1 + $0x78] sm:$0xff]  ;;  %s382_s30 = scalar_lea.vmem [#allocation3], %s2042_s25  ;;  %s2486_s25 = scalar_lea.vmem %s2485_s18, 64 }
  0x1c   : > { %v1165_v38 = vld [vmem:[%s3450_s6] sm:$0xff]  ;;  %v1167_v39 = vld [vmem:[%s3450_s6 + $0x10] sm:$0xff]  ;;  %v699_v55 = vld [vmem:[%s3446_s2 + $0x78] sm:$0xff]  ;;  %s1979_s12 = sshll.u32 %s382_s30, 4  ;;  %s3404_s12 = int_to_ptr.vmem [resolvable:$true] %s1979_s12 }
  0x1d   : > { %v1169_v40 = vld [vmem:[%s3450_s6 + $0x20] sm:$0xff]  ;;  %v694_v41 = vld [vmem:[%s3446_s2 + $0x50] sm:$0xff]  ;;  %v861_v59 = vld [vmem:[%s3448_s4 + $0x8] sm:$0xff]  ;;  %s2480_s17 = scalar_lea.vmem %s3404_s12, 32  ;;  %p2487_p0 = scmp.lt.s32.totalorder %s3404_s12, %s2485_s18 }
  0x1e   : > { %571 = vperm.xlu0 %2208, %v399_v9   ;;  %v1171_v42 = vld [vmem:[%s3450_s6 + $0x30] sm:$0xff]  ;;  %v1173_v43 = vld [vmem:[%s3450_s6 + $0x40] sm:$0xff]  ;;  %v863_v63 = vld [vmem:[%s3448_s4 + $0x18] sm:$0xff]  ;;  %p2481_p11 = scmp.ne.s32.totalorder %s3404_s12, %s2480_s17  ;;  %p2488_p1 = scmp.lt.s32.totalorder %s2486_s25, %s2480_s17 }
  0x1f   : > { %2209 = vset.pattern.permute.xlu1 %v2544_v3  ;;  %v1175_v45 = vld [vmem:[%s3450_s6 + $0x50] sm:$0xff]  ;;  %v1177_v46 = vld [vmem:[%s3450_s6 + $0x60] sm:$0xff] }
  0x20   : > { %551 = vperm.xlu1 %2209, %v394_v7   ;;  %v696_v47 = vld [vmem:[%s3446_s2 + $0x60] sm:$0xff]  ;;  %v1179_v48 = vld [vmem:[%s3450_s6 + $0x70] sm:$0xff]  ;;  %p2482_p12 = pnand %p2481_p11, %p2650_p5  ;;  %p2489_p2 = por %p2488_p1, %p2487_p0 }
  0x21   : > { %v698_v51 = vld [vmem:[%s3446_s2 + $0x70] sm:$0xff]  ;;  %v1470_v52 = vld [vmem:[%s3452_s8] sm:$0xff] }
  0x22   : > { %579 = vperm.xlu0 %2208, %v401_v10   ;;  %v1472_v56 = vld [vmem:[%s3452_s8 + $0x10] sm:$0xff]  ;;  %v1474_v60 = vld [vmem:[%s3452_s8 + $0x20] sm:$0xff]  ;;  %p2483_p13 = pneg %p2482_p12 }
  0x24   : > { %2210 = vset.pattern.permute.xlu1 %v2545_v8  ;;  %p2490_p3 = pnand %p2489_p2, %p2483_p13 }
  0x25   : > { %702 = vperm.xlu1 %2210, %v684_v11  }
  0x26   : > { %587 = vperm.xlu0 %2208, %v2694_v12  }
  0x29   : > { %429 = vperm.xlu1 %2210, %v395_v4   ;;  %v865_v4 = vld [vmem:[%s3448_s4 + $0x28] sm:$0xff] }
  0x2a   : > { %595 = vperm.xlu0 %2208, %v2701_v13  }
  0x2d   : > { %434 = vperm.xlu1 %2210, %v396_v14  }
  0x2e   : > { %2221 = vset.pattern.permute.xlu0 %v2545_v8 }
  0x2f   : > { %409 = vperm.xlu0 %2221, %v391_v2  }
  0x31   : > { %2211 = vset.pattern.permute.xlu1 %v2544_v3 }
  0x32   : > { %559 = vperm.xlu1 %2211, %v396_v14  }
  0x33   : > { %414 = vperm.xlu0 %2221, %v392_v5  }
  0x36   : > { %2212 = vset.pattern.permute.xlu1 %v2545_v8 }
  0x37   : > { %419 = vperm.xlu0 %2221, %v393_v1   ;;  %712 = vperm.xlu1 %2212, %v686_v15   ;;  %v1476_v1 = vld [vmem:[%s3452_s8 + $0x30] sm:$0xff]  ;;  %v1478_v15 = vld [vmem:[%s3452_s8 + $0x40] sm:$0xff] }
  0x3b   : > { %707 = vperm.xlu0 %2221, %v685_v16   ;;  %439 = vperm.xlu1 %2212, %v397_v6   ;;  %v1759_v6 = vld [vmem:[%s3453_s9] sm:$0xff] }
  0x3f   : > { %717 = vperm.xlu0 %2221, %v687_v17   ;;  %444 = vperm.xlu1 %2212, %v398_v18  }
  0x43   : > { %727 = vperm.xlu0 %2221, %v689_v19   ;;  %2213 = vset.pattern.permute.xlu1 %v2544_v3  ;;  %v869_v19 = vld [vmem:[%s3448_s4 + $0x48] sm:$0xff] }
  0x44   : > { %567 = vperm.xlu1 %2213, %v398_v18  }
  0x47   : > { %737 = vperm.xlu0 %2221, %v691_v20  }
  0x48   : > { %2214 = vset.pattern.permute.xlu1 %v2545_v8 }
  0x49   : > { %722 = vperm.xlu1 %2214, %v688_v21  }
  0x4b   : > { %747 = vperm.xlu0 %2221, %v693_v22   ;;  %v2546_v22 = vmov 0.0  }
  0x4c   : > { %1020 = vmatprep.mubr.f32.mxu0 %v2546_v22  ;;  %1068 = vmatprep.mubr.f32.mxu1 %v2546_v22 }
  0x4d   : > { %449 = vperm.xlu1 %2214, %v399_v9  }
  0x4f   : > { %757 = vperm.xlu0 %2221, %v695_v23  }
  0x51   : > { %454 = vperm.xlu1 %2214, %v400_v24  }
  0x53   : > { %767 = vperm.xlu0 %2221, %v697_v25  }
  0x55   : > { %2215 = vset.pattern.permute.xlu1 %v2544_v3 }
  0x56   : > { %575 = vperm.xlu1 %2215, %v400_v24   ;;  %v1479_v24 = vld [vmem:[%s3452_s8 + $0x48] sm:$0xff] }
  0x57   : > { %878 = vperm.xlu0 %2221, %v860_v26  }
  0x5a   : > { %2216 = vset.pattern.permute.xlu1 %v2545_v8 }
  0x5b   : > { %888 = vperm.xlu0 %2221, %v862_v27   ;;  %732 = vperm.xlu1 %2216, %v690_v28   ;;  %v871_v28 = vld [vmem:[%s3448_s4 + $0x58] sm:$0xff] }
  0x5f   : > { %898 = vperm.xlu0 %2221, %v864_v29   ;;  %459 = vperm.xlu1 %2216, %v401_v10   ;;  %v867_v10 = vld [vmem:[%s3448_s4 + $0x38] sm:$0xff] }
  0x63   : > { %908 = vperm.xlu0 %2221, %v866_v30   ;;  %464 = vperm.xlu1 %2216, %v402_v31  }
  0x67   : > { %918 = vperm.xlu0 %2221, %v868_v32   ;;  %2217 = vset.pattern.permute.xlu1 %v2544_v3  ;;  %v1480_v32 = vld [vmem:[%s3452_s8 + $0x50] sm:$0xff] }
  0x68   : > { %583 = vperm.xlu1 %2217, %v402_v31  }
  0x6b   : > { %928 = vperm.xlu0 %2221, %v870_v33  }
  0x6c   : > { %2218 = vset.pattern.permute.xlu1 %v2545_v8 }
  0x6d   : > { %742 = vperm.xlu1 %2218, %v692_v34  }
  0x6f   : > { %938 = vperm.xlu0 %2221, %v872_v35  }
  0x71   : > { %469 = vperm.xlu1 %2218, %v2694_v12   ;;  %v390_v12 = vld [vmem:[%s387_s16] sm:$0xf]  ;;  %s1965_s16 = scalar_lea.sflag [#allocation4], %s380_s23 }
  0x73   : > { %948 = vperm.xlu0 %2221, %v874_v36  }
  0x75   : > { %474 = vperm.xlu1 %2218, %v404_v37  }
  0x77   : > { %1183 = vperm.xlu0 %2221, %v1165_v38  }
  0x79   : > { %2219 = vset.pattern.permute.xlu1 %v2544_v3 }
  0x7a   : > { %591 = vperm.xlu1 %2219, %v404_v37   ;;  %v873_v37 = vld [vmem:[%s3448_s4 + $0x68] sm:$0xff] }
  0x7b   : > { %1193 = vperm.xlu0 %2221, %v1167_v39  }
  0x7e   : > { %2220 = vset.pattern.permute.xlu1 %v2545_v8 }
  0x7f   : > { %1203 = vperm.xlu0 %2221, %v1169_v40   ;;  %752 = vperm.xlu1 %2220, %v694_v41   ;;  %v1481_v40 = vld [vmem:[%s3452_s8 + $0x58] sm:$0xff] }
  0x83   : > { %1213 = vperm.xlu0 %2221, %v1171_v42   ;;  %479 = vperm.xlu1 %2220, %v2701_v13  }
  0x87   : > { %1223 = vperm.xlu0 %2221, %v1173_v43   ;;  %484 = vperm.xlu1 %2220, %v406_v44  }
  0x8b   : > { %1233 = vperm.xlu0 %2221, %v1175_v45   ;;  %2222 = vset.pattern.permute.xlu1 %v2544_v3  ;;  %v2868_v3 = vshrl.u32 %v488_v62, 7 }
  0x8c   : > { %599 = vperm.xlu1 %2222, %v406_v44  }
  0x8d   : > { %v2885_v9 = vsub.s32 0, %v2868_v3  ;;  %v608_v11 = vsub.s32 3, %v2868_v3  ;;  %v494_v13 = vsub.s32 2, %v2868_v3 }
  0x8f   : > { %1243 = vperm.xlu0 %2221, %v1177_v46   ;;  %v491_v18 = vrot.slane %v390_v12, %v2885_v9  ;;  %v609_v20 = vrot.slane %v390_v12, %v608_v11  ;;  %v495_v21 = vrot.slane %v390_v12, %v494_v13  ;;  %v1166_v11 = vld [vmem:[%s3450_s6 + $0x8] sm:$0xff] }
  0x90   : > { %2223 = vset.pattern.permute.xlu1 %v2545_v8  ;;  %v604_v8 = vsub.s32 1, %v2868_v3 }
  0x91   : > { %762 = vperm.xlu1 %2223, %v696_v47   ;;  %v2824_v49 = vpop.permute.xlu1 %539  ;;  %v2826_v50 = vpop.permute.xlu0 %547  ;;  %v2913_v26 = vrot.slane %v491_v18, %v2885_v9  ;;  %v2921_v30 = vrot.slane %v495_v21, %v2885_v9  ;;  %v875_v47 = vld [vmem:[%s3448_s4 + $0x78] sm:$0xff] }
  0x92   : > { %v605_v17 = vrot.slane %v390_v12, %v604_v8  ;;  %v2918_v29 = vrot.slane %v609_v20, %v604_v8 }
  0x93   : > { %1253 = vperm.xlu0 %2221, %v1179_v48  }
  0x94   : > { %v2910_v25 = vrot.slane %v605_v17, %v604_v8  ;;  %v621_v38 = vmul.f32 %v2918_v29, %v2824_v49  ;;  %v625_v41 = vmul.f32 %v2918_v29, %v2826_v50  ;;  %v1483_v17 = vld [vmem:[%s3452_s8 + $0x68] sm:$0xff] }
  0x95   : > { %772 = vperm.xlu1 %2223, %v698_v51   ;;  %v2834_v53 = vpop.permute.xlu1 %543  ;;  %v2836_v54 = vpop.permute.xlu0 %555 }
  0x96   : > { %v620_v35 = vmul.f32 %v2910_v25, %v2824_v49  ;;  %v624_v48 = vmul.f32 %v2910_v25, %v2826_v50  ;;  %v622_v49 = vmul.f32 %v2910_v25, %v2834_v53  ;;  %v1482_v50 = vld [vmem:[%s3452_s8 + $0x60] sm:$0xff] }
  0x97   : > { %1488 = vperm.xlu0 %2221, %v1470_v52  }
  0x99   : > { %777 = vperm.xlu1 %2223, %v699_v55   ;;  %v2845_v57 = vpop.permute.xlu0 %563  ;;  %v623_v55 = vmul.f32 %v2918_v29, %v2834_v53 }
  0x9a   : > { %v2847_v58 = vpop.permute.xlu1 %424 }
  0x9b   : > { %1498 = vperm.xlu0 %2221, %v1472_v56   ;;  %v512_v53 = vmul.f32 %v2913_v26, %v2847_v58  ;;  %v513_v12 = vmul.f32 %v2921_v30, %v2847_v58  ;;  %v1168_v58 = vld [vmem:[%s3450_s6 + $0x18] sm:$0xff] }
  0x9d   : > { %883 = vperm.xlu1 %2223, %v861_v59   ;;  %v2855_v61 = vpop.permute.xlu0 %571 }
  0x9f   : > { %1508 = vperm.xlu0 %2221, %v1474_v60   ;;  %v2860_v0 = vpop.permute.xlu1 %551 }
  0xa0   : > { %v626_v56 = vmul.f32 %v2910_v25, %v2860_v0  ;;  %v627_v60 = vmul.f32 %v2918_v29, %v2860_v0 }
  0xa1   : > { %893 = vperm.xlu1 %2223, %v863_v63   ;;  %v2865_v2 = vpop.permute.xlu0 %579 }
  0xa2   : > { %v658_v18 = vadd.f32 %v626_v56, %v512_v53 }
  0xa3   : > { %1518 = vperm.xlu0 %2221, %v1476_v1  }
  0xa4   : > { %v2876_v5 = vpop.permute.xlu1 %702 }
  0xa5   : > { %903 = vperm.xlu1 %2223, %v865_v4   ;;  %v2881_v7 = vpop.permute.xlu0 %587 }
  0xa7   : > { %1777 = vperm.xlu0 %2221, %v1759_v6  }
  0xa8   : > { %v2892_v14 = vpop.permute.xlu1 %429 }
  0xa9   : > { %913 = vperm.xlu1 %2223, %v867_v10   ;;  %v2897_v16 = vpop.permute.xlu0 %595 }
  0xab   : > { %1528 = vperm.xlu0 %2221, %v1478_v15  }
  0xac   : > { %v2904_v23 = vpop.permute.xlu1 %434 }
  0xad   : > { %923 = vperm.xlu1 %2223, %v869_v19   ;;  %v659_v19 = vadd.f32 %v627_v60, %v513_v12 }
  0xae   : > { %v410_v27 = vpop.permute.xlu0 %409 }
  0xaf   : > { %1533 = vperm.xlu0 %2221, %v1479_v24   ;;  %v506_v31 = vmul.f32 %v2913_v26, %v410_v27  ;;  %v507_v33 = vmul.f32 %v2921_v30, %v410_v27 }
  0xb1   : > { %933 = vperm.xlu1 %2223, %v871_v28   ;;  %v560_v34 = vpop.permute.xlu1 %559  ;;  %v652_v39 = vadd.f32 %v620_v35, %v506_v31  ;;  %v653_v42 = vadd.f32 %v621_v38, %v507_v33  ;;  %v628_v35 = vmul.f32 %v2910_v25, %v2836_v54  ;;  %v1170_v38 = vld [vmem:[%s3450_s6 + $0x28] sm:$0xff] }
  0xb2   : > { %v415_v36 = vpop.permute.xlu0 %414  ;;  %v630_v31 = vmul.f32 %v2910_v25, %v560_v34  ;;  %v631_v33 = vmul.f32 %v2918_v29, %v560_v34  ;;  %v515_v34 = vmul.f32 %v2921_v30, %v2892_v14 }
  0xb3   : > { %1538 = vperm.xlu0 %2221, %v1480_v32   ;;  %v508_v43 = vmul.f32 %v2913_v26, %v415_v36  ;;  %v509_v44 = vmul.f32 %v2921_v30, %v415_v36  ;;  %v780_v59 = vadd.f32 %v2876_v5, %v652_v39  ;;  %v781_v63 = vadd.f32 %v2876_v5, %v653_v42  ;;  %v1484_v32 = vld [vmem:[%s3452_s8 + $0x70] sm:$0xff] }
  0xb4   : > { %v629_v36 = vmul.f32 %v2918_v29, %v2836_v54  ;;  %v514_v39 = vmul.f32 %v2913_v26, %v2892_v14  ;;  %v1172_v14 = vld [vmem:[%s3450_s6 + $0x38] sm:$0xff] }
  0xb5   : > { %943 = vperm.xlu1 %2223, %v873_v37   ;;  %v654_v4 = vadd.f32 %v622_v49, %v508_v43  ;;  %v655_v8 = vadd.f32 %v623_v55, %v509_v44  ;;  %2224 = vtanh.f32 %v780_v59  ;;  %v516_v37 = vmul.f32 %v2913_v26, %v2904_v23  ;;  %v1485_v43 = vld [vmem:[%s3452_s8 + $0x78] sm:$0xff]  ;;  %v1769_v55 = vld [vmem:[%s3453_s9 + $0x50] sm:$0xff] }
  0xb6   : > { %v420_v45 = vpop.permute.xlu0 %419  ;;  %v713_v46 = vpop.permute.xlu1 %712  ;;  %2226 = vtanh.f32 %v781_v63  ;;  %v661_v49 = vadd.f32 %v629_v36, %v515_v34 }
  0xb7   : > { %v510_v51 = vmul.f32 %v2913_v26, %v420_v45  ;;  %v511_v52 = vmul.f32 %v2921_v30, %v420_v45  ;;  %1543 = vperm.xlu0 %2221, %v1481_v40   ;;  %v517_v40 = vmul.f32 %v2921_v30, %v2904_v23  ;;  %v662_v42 = vadd.f32 %v630_v31, %v516_v37  ;;  %v1178_v31 = vld [vmem:[%s3450_s6 + $0x68] sm:$0xff] }
  0xb8   : > { %v660_v23 = vadd.f32 %v628_v35, %v514_v39  ;;  %v1929_v39 = vld [vmem:[#allocation2] sm:$0x1] }
  0xb9   : > { %v657_v1 = vadd.f32 %v625_v41, %v511_v52  ;;  %953 = vperm.xlu1 %2223, %v875_v47   ;;  %v656_v0 = vadd.f32 %v624_v48, %v510_v51  ;;  %v663_v44 = vadd.f32 %v631_v33, %v517_v40  ;;  %v633_v33 = vmul.f32 %v2918_v29, %v2845_v57 }
  0xba   : > { %v708_v6 = vpop.permute.xlu0 %707  ;;  %v2964_v10 = vpop.permute.xlu1 %439 }
  0xbb   : > { %v785_v13 = vadd.f32 %v713_v46, %v657_v1  ;;  %v782_v5 = vadd.f32 %v708_v6, %v654_v4  ;;  %1548 = vperm.xlu0 %2221, %v1482_v50   ;;  %v783_v15 = vadd.f32 %v708_v6, %v655_v8  ;;  %v784_v24 = vadd.f32 %v713_v46, %v656_v0  ;;  %v1174_v8 = vld [vmem:[%s3450_s6 + $0x48] sm:$0xff]  ;;  %v1771_v0 = vld [vmem:[%s3453_s9 + $0x60] sm:$0xff] }
  0xbc   : > { %v518_v35 = vmul.f32 %v2913_v26, %v2964_v10 }
  0xbd   : > { %1188 = vperm.xlu1 %2223, %v1166_v11   ;;  %2228 = vtanh.f32 %v785_v13 }
  0xbe   : > { %v718_v20 = vpop.permute.xlu0 %717  ;;  %v2974_v21 = vpop.permute.xlu1 %444  ;;  %2230 = vtanh.f32 %v782_v5 }
  0xbf   : > { %v786_v27 = vadd.f32 %v718_v20, %v658_v18  ;;  %v787_v28 = vadd.f32 %v718_v20, %v659_v19  ;;  %1553 = vperm.xlu0 %2221, %v1483_v17   ;;  %2232 = vtanh.f32 %v783_v15  ;;  %v2225_v45 = vpop.eup %2224  ;;  %v1176_v17 = vld [vmem:[%s3450_s6 + $0x58] sm:$0xff]  ;;  %v1773_v19 = vld [vmem:[%s3453_s9 + $0x70] sm:$0xff]  ;;  %v520_v20 = vmul.f32 %v2913_v26, %v2974_v21 }
  0xc0   : > { %v2227_v47 = vpop.eup %2226 }
  0xc1   : > { %2234 = vtanh.f32 %v786_v27  ;;  %1198 = vperm.xlu1 %2223, %v1168_v58   ;;  %v521_v58 = vmul.f32 %v2921_v30, %v2974_v21  ;;  %v632_v27 = vmul.f32 %v2910_v25, %v2845_v57  ;;  %v519_v21 = vmul.f32 %v2921_v30, %v2964_v10  ;;  %v1180_v57 = vld [vmem:[%s3450_s6 + $0x78] sm:$0xff] }
  0xc2   : > { %2236 = vtanh.f32 %v787_v28  ;;  %v728_v41 = vpop.permute.xlu0 %727 }
  0xc3   : > { %2238 = vtanh.f32 %v784_v24  ;;  %1558 = vperm.xlu0 %2221, %v1484_v32   ;;  %v568_v54 = vpop.permute.xlu1 %567  ;;  %v790_v46 = vadd.f32 %v728_v41, %v662_v42  ;;  %v791_v48 = vadd.f32 %v728_v41, %v663_v44  ;;  %v664_v44 = vadd.f32 %v632_v27, %v518_v35 }
  0xc4   : > { %v634_v5 = vmul.f32 %v2910_v25, %v568_v54  ;;  %v635_v18 = vmul.f32 %v2918_v29, %v568_v54 }
  0xc5   : > { %1208 = vperm.xlu1 %2223, %v1170_v38   ;;  %2240 = vtanh.f32 %v790_v46 }
  0xc6   : > { %2242 = vtanh.f32 %v791_v48  ;;  %v666_v28 = vadd.f32 %v634_v5, %v520_v20  ;;  %v738_v36 = vpop.permute.xlu0 %737  ;;  %v667_v37 = vadd.f32 %v635_v18, %v521_v58 }
  0xc7   : > { %1563 = vperm.xlu0 %2221, %v1485_v43   ;;  %v2229_v51 = vpop.eup %2228 }
  0xc8   : > { %v723_v52 = vpop.permute.xlu1 %722  ;;  %v2231_v56 = vpop.eup %2230  ;;  %v794_v54 = vadd.f32 %v738_v36, %v666_v28  ;;  %v795_v43 = vadd.f32 %v738_v36, %v667_v37 }
  0xc9   : > { %v788_v59 = vadd.f32 %v723_v52, %v660_v23  ;;  %v789_v50 = vadd.f32 %v723_v52, %v661_v49  ;;  %1218 = vperm.xlu1 %2223, %v1172_v14   ;;  %v2233_v60 = vpop.eup %2232  ;;  %v2053_v63 = vpack.c.bf16 %v2231_v56, %v2225_v45  ;;  %v665_v45 = vadd.f32 %v633_v33, %v519_v21  ;;  %v1473_v23 = vld [vmem:[%s3452_s8 + $0x18] sm:$0xff]  ;;  %v1475_v56 = vld [vmem:[%s3452_s8 + $0x28] sm:$0xff] }
  0xca   : > { %v2051_v4 = vpack.c.bf16 %v2233_v60, %v2227_v47  ;;  %v1471_v47 = vld [vmem:[%s3452_s8 + $0x8] sm:$0xff]  ;;  %v636_v60 = vmul.f32 %v2910_v25, %v2855_v61  ;;  %v1762_v21 = vld [vmem:[%s3453_s9 + $0x18] sm:$0xff] }
  0xcb   : > { %v2235_v1 = vpop.eup %2234  ;;  %1827 = vperm.xlu0 %2221, %v1769_v55   ;;  %2244 = vtanh.f32 %v788_v59 }
  0xcc   : > { %v2237_v53 = vpop.eup %2236  ;;  %v3008_v6 = vpop.permute.xlu1 %449  ;;  %2246 = vtanh.f32 %v789_v50  ;;  %2052 = vmatprep.subr.bf16.mxu0 %v2051_v4  ;;  %2147 = vmatprep.subr.bf16.mxu1 %v2051_v4  ;;  %v637_v4 = vmul.f32 %v2918_v29, %v2855_v61 }
  0xcd   : > { %v2239_v11 = vpop.eup %2238  ;;  %v2055_v12 = vpack.c.bf16 %v2237_v53, %v2229_v51  ;;  %2054 = vmatpush1.bf16.msra.mxu0 %v2053_v63  ;;  %2155 = vmatpush1.bf16.msra.mxu1 %v2053_v63  ;;  %2248 = vtanh.f32 %v794_v54  ;;  %v522_v53 = vmul.f32 %v2913_v26, %v3008_v6 }
  0xce   : > { %v2057_v13 = vpack.c.bf16 %v2235_v1, %v2239_v11  ;;  %1228 = vperm.xlu1 %2223, %v1174_v8   ;;  %2250 = vtanh.f32 %v795_v43  ;;  %v523_v8 = vmul.f32 %v2921_v30, %v3008_v6 }
  0xcf   : > { %2056 = vmatprep.subr.bf16.mxu0 %v2055_v12  ;;  %2148 = vmatprep.subr.bf16.mxu1 %v2055_v12  ;;  %v2241_v24 = vpop.eup %2240  ;;  %v668_v20 = vadd.f32 %v636_v60, %v522_v53 }
  0xd0   : > { %1837 = vperm.xlu0 %2221, %v1771_v0   ;;  %v455_v15 = vpop.permute.xlu1 %454  ;;  %v2243_v32 = vpop.eup %2242  ;;  %v669_v58 = vadd.f32 %v637_v4, %v523_v8 }
  0xd1   : > { %2058 = vmatpush1.bf16.msra.mxu0 %v2057_v13  ;;  %2156 = vmatpush1.bf16.msra.mxu1 %v2057_v13  ;;  %v524_v55 = vmul.f32 %v2913_v26, %v455_v15  ;;  %v525_v59 = vmul.f32 %v2921_v30, %v455_v15  ;;  %v1477_v13 = vld [vmem:[%s3452_s8 + $0x38] sm:$0xff]  ;;  %v748_v15 = vpop.permute.xlu0 %747 }
  0xd2   : > { %1238 = vperm.xlu1 %2223, %v1176_v17  }
  0xd4   : > { %1847 = vperm.xlu0 %2221, %v1773_v19  }
  0xd5   : > { %v576_v38 = vpop.permute.xlu1 %575  ;;  %v2245_v34 = vpop.eup %2244 }
  0xd6   : > { %v2247_v40 = vpop.eup %2246  ;;  %1248 = vperm.xlu1 %2223, %v1178_v31   ;;  %v2061_v41 = vpack.c.bf16 %v2241_v24, %v2245_v34  ;;  %v638_v49 = vmul.f32 %v2910_v25, %v576_v38  ;;  %v639_v52 = vmul.f32 %v2918_v29, %v576_v38  ;;  %v1760_v24 = vld [vmem:[%s3453_s9 + $0x8] sm:$0xff] }
  0xd7   : > { %v2059_v42 = vpack.c.bf16 %v2243_v32, %v2247_v40  ;;  %v2249_v50 = vpop.eup %2248  ;;  %v1761_v32 = vld [vmem:[%s3453_s9 + $0x10] sm:$0xff]  ;;  %v1763_v40 = vld [vmem:[%s3453_s9 + $0x20] sm:$0xff] }
  0xd8   : > { %1932 = vperm.xlu0 %2221, %v1929_v39   ;;  %v670_v63 = vadd.f32 %v638_v49, %v524_v55  ;;  %v2251_v1 = vpop.eup %2250  ;;  %v671_v11 = vadd.f32 %v639_v52, %v525_v59 }
  0xd9   : > { %2060 = vmatprep.subr.bf16.mxu0 %v2059_v42  ;;  %2149 = vmatprep.subr.bf16.mxu1 %v2059_v42 }
  0xda   : > { %v733_v10 = vpop.permute.xlu1 %732  ;;  %1258 = vperm.xlu1 %2223, %v1180_v57   ;;  %2062 = vmatpush1.bf16.msra.mxu0 %v2061_v41  ;;  %v798_v18 = vadd.f32 %v748_v15, %v670_v63  ;;  %v799_v61 = vadd.f32 %v748_v15, %v671_v11  ;;  %v1766_v63 = vld [vmem:[%s3453_s9 + $0x38] sm:$0xff] }
  0xdb   : > { %v792_v46 = vadd.f32 %v733_v10, %v664_v44  ;;  %v793_v14 = vadd.f32 %v733_v10, %v665_v45  ;;  %2157 = vmatpush1.bf16.msra.mxu1 %v2061_v41  ;;  %v640_v10 = vmul.f32 %v2910_v25, %v2865_v2 }
  0xdd   : > { %2252 = vtanh.f32 %v792_v46  ;;  %v641_v46 = vmul.f32 %v2918_v29, %v2865_v2  ;;  %v1765_v2 = vld [vmem:[%s3453_s9 + $0x30] sm:$0xff] }
  0xde   : > { %v460_v48 = vpop.permute.xlu1 %459  ;;  %2254 = vtanh.f32 %v793_v14  ;;  %1493 = vperm.xlu1 %2223, %v1471_v47   ;;  %v758_v14 = vpop.permute.xlu0 %757 }
  0xdf   : > { %2256 = vtanh.f32 %v798_v18  ;;  %v526_v54 = vmul.f32 %v2913_v26, %v460_v48  ;;  %v527_v42 = vmul.f32 %v2921_v30, %v460_v48 }
  0xe0   : > { %2258 = vtanh.f32 %v799_v61 }
  0xe1   : > { %v672_v52 = vadd.f32 %v640_v10, %v526_v54  ;;  %v673_v55 = vadd.f32 %v641_v46, %v527_v42 }
  0xe2   : > { %v465_v51 = vpop.permute.xlu1 %464  ;;  %1503 = vperm.xlu1 %2223, %v1473_v23  }
  0xe3   : > { %v528_v37 = vmul.f32 %v2913_v26, %v465_v51  ;;  %v529_v38 = vmul.f32 %v2921_v30, %v465_v51  ;;  %v1764_v51 = vld [vmem:[%s3453_s9 + $0x28] sm:$0xff] }
  0xe6   : > { %1513 = vperm.xlu1 %2223, %v1475_v56  }
  0xe7   : > { %v584_v12 = vpop.permute.xlu1 %583  ;;  %v2253_v0 = vpop.eup %2252 }
  0xe8   : > { %v2255_v5 = vpop.eup %2254  ;;  %v2065_v17 = vpack.c.bf16 %v2249_v50, %v2253_v0  ;;  %v642_v33 = vmul.f32 %v2910_v25, %v584_v12  ;;  %v643_v36 = vmul.f32 %v2918_v29, %v584_v12  ;;  %v1767_v12 = vld [vmem:[%s3453_s9 + $0x40] sm:$0xff] }
  0xe9   : > { %v2063_v19 = vpack.c.bf16 %v2251_v1, %v2255_v5  ;;  %v2257_v39 = vpop.eup %2256 }
  0xea   : > { %1523 = vperm.xlu1 %2223, %v1477_v13   ;;  %v674_v34 = vadd.f32 %v642_v33, %v528_v37  ;;  %v2259_v41 = vpop.eup %2258  ;;  %v675_v57 = vadd.f32 %v643_v36, %v529_v38 }
  0xeb   : > { %2064 = vmatprep.subr.bf16.mxu0 %v2063_v19  ;;  %2150 = vmatprep.subr.bf16.mxu1 %v2063_v19 }
  0xec   : > { %v743_v6 = vpop.permute.xlu1 %742  ;;  %2066 = vmatpush1.bf16.msra.mxu0 %v2065_v17  ;;  %2158 = vmatpush1.bf16.msra.mxu1 %v2065_v17  ;;  %v802_v23 = vadd.f32 %v758_v14, %v674_v34  ;;  %v803_v48 = vadd.f32 %v758_v14, %v675_v57 }
  0xed   : > { %v796_v27 = vadd.f32 %v743_v6, %v668_v20  ;;  %v797_v28 = vadd.f32 %v743_v6, %v669_v58  ;;  %v768_v20 = vpop.permute.xlu0 %767  ;;  %v1768_v58 = vld [vmem:[%s3453_s9 + $0x48] sm:$0xff] }
  0xee   : > { %1782 = vperm.xlu1 %2223, %v1760_v24   ;;  %v644_v24 = vmul.f32 %v2910_v25, %v2881_v7 }
  0xef   : > { %2260 = vtanh.f32 %v796_v27  ;;  %v645_v27 = vmul.f32 %v2918_v29, %v2881_v7  ;;  %v648_v7 = vmul.f32 %v2910_v25, %v2897_v16 }
  0xf0   : > { %v470_v31 = vpop.permute.xlu1 %469  ;;  %2262 = vtanh.f32 %v797_v28 }
  0xf1   : > { %2264 = vtanh.f32 %v802_v23  ;;  %v530_v17 = vmul.f32 %v2913_v26, %v470_v31  ;;  %v531_v18 = vmul.f32 %v2921_v30, %v470_v31  ;;  %v1774_v23 = vld [vmem:[%s3453_s9 + $0x78] sm:$0xff] }
  0xf2   : > { %1787 = vperm.xlu1 %2223, %v1761_v32   ;;  %2266 = vtanh.f32 %v803_v48 }
  0xf3   : > { %v677_v36 = vadd.f32 %v645_v27, %v531_v18  ;;  %v849_v18 = vld [vmem:[%s3447_s3 + $0x28] sm:$0xff] }
  0xf4   : > { %v475_v35 = vpop.permute.xlu1 %474 }
  0xf5   : > { %v532_v8 = vmul.f32 %v2913_v26, %v475_v35  ;;  %v533_v11 = vmul.f32 %v2921_v30, %v475_v35 }
  0xf6   : > { %1792 = vperm.xlu1 %2223, %v1762_v21   ;;  %v676_v21 = vadd.f32 %v644_v24, %v530_v17  ;;  %v856_v17 = vld [vmem:[%s3447_s3 + $0x60] sm:$0xff]  ;;  %v879_v24 = vpop.permute.xlu0 %878 }
  0xf9   : > { %v592_v43 = vpop.permute.xlu1 %591  ;;  %v2261_v44 = vpop.eup %2260 }
  0xfa   : > { %v2263_v45 = vpop.eup %2262  ;;  %1797 = vperm.xlu1 %2223, %v1763_v40   ;;  %v2069_v47 = vpack.c.bf16 %v2257_v39, %v2261_v44  ;;  %v646_v1 = vmul.f32 %v2910_v25, %v592_v43  ;;  %v647_v4 = vmul.f32 %v2918_v29, %v592_v43  ;;  %v1770_v39 = vld [vmem:[%s3453_s9 + $0x58] sm:$0xff] }
  0xfb   : > { %v2067_v49 = vpack.c.bf16 %v2259_v41, %v2263_v45  ;;  %v2265_v13 = vpop.eup %2264  ;;  %v649_v41 = vmul.f32 %v2918_v29, %v2897_v16  ;;  %v1772_v45 = vld [vmem:[%s3453_s9 + $0x68] sm:$0xff] }
  0xfc   : > { %v678_v0 = vadd.f32 %v646_v1, %v532_v8  ;;  %v679_v5 = vadd.f32 %v647_v4, %v533_v11  ;;  %v2267_v15 = vpop.eup %2266  ;;  %v844_v4 = vld [vmem:[%s3447_s3] sm:$0xff]  ;;  %v845_v8 = vld [vmem:[%s3447_s3 + $0x8] sm:$0xff] }
  0xfd   : > { %2068 = vmatprep.subr.bf16.mxu0 %v2067_v49  ;;  %2151 = vmatprep.subr.bf16.mxu1 %v2067_v49  ;;  %v853_v11 = vld [vmem:[%s3447_s3 + $0x48] sm:$0xff] }
  0xfe   : > { %v753_v56 = vpop.permute.xlu1 %752  ;;  %1802 = vperm.xlu1 %2223, %v1764_v51   ;;  %2070 = vmatpush1.bf16.msra.mxu0 %v2069_v47  ;;  %v806_v28 = vadd.f32 %v768_v20, %v678_v0  ;;  %v807_v33 = vadd.f32 %v768_v20, %v679_v5  ;;  %v854_v0 = vld [vmem:[%s3447_s3 + $0x50] sm:$0xff]  ;;  %v855_v5 = vld [vmem:[%s3447_s3 + $0x58] sm:$0xff] }
  0xff   : > { %v800_v59 = vadd.f32 %v753_v56, %v672_v52  ;;  %v801_v50 = vadd.f32 %v753_v56, %v673_v55  ;;  %2159 = vmatpush1.bf16.msra.mxu1 %v2069_v47  ;;  %v858_v20 = vld [vmem:[%s3447_s3 + $0x70] sm:$0xff] }
 0x101   : > { %2268 = vtanh.f32 %v800_v59 }
 0x102   : > { %v480_v60 = vpop.permute.xlu1 %479  ;;  %2270 = vtanh.f32 %v801_v50  ;;  %1807 = vperm.xlu1 %2223, %v1765_v2  }
 0x103   : > { %v534_v31 = vmul.f32 %v2913_v26, %v480_v60  ;;  %v535_v37 = vmul.f32 %v2921_v30, %v480_v60  ;;  %2272 = vtanh.f32 %v806_v28  ;;  %v889_v28 = vpop.permute.xlu0 %888 }
 0x104   : > { %2274 = vtanh.f32 %v807_v33 }
 0x105   : > { %v680_v57 = vadd.f32 %v648_v7, %v534_v31  ;;  %v681_v44 = vadd.f32 %v649_v41, %v535_v37 }
 0x106   : > { %v485_v53 = vpop.permute.xlu1 %484  ;;  %1812 = vperm.xlu1 %2223, %v1766_v63  }
 0x107   : > { %v536_v10 = vmul.f32 %v2913_v26, %v485_v53  ;;  %v537_v46 = vmul.f32 %v2921_v30, %v485_v53  ;;  %v852_v53 = vld [vmem:[%s3447_s3 + $0x40] sm:$0xff]  ;;  %v3196_v33 = vpop.permute.xlu0 %898 }
 0x10a   : > { %1817 = vperm.xlu1 %2223, %v1767_v12   ;;  %v846_v12 = vld [vmem:[%s3447_s3 + $0x10] sm:$0xff] }
 0x10b   : > { %v600_v19 = vpop.permute.xlu1 %599  ;;  %v2269_v61 = vpop.eup %2268 }
 0x10c   : > { %v2271_v6 = vpop.eup %2270  ;;  %v2073_v32 = vpack.c.bf16 %v2265_v13, %v2269_v61  ;;  %v650_v54 = vmul.f32 %v2910_v25, %v600_v19  ;;  %v651_v42 = vmul.f32 %v2918_v29, %v600_v19  ;;  %v847_v13 = vld [vmem:[%s3447_s3 + $0x18] sm:$0xff]  ;;  %v857_v19 = vld [vmem:[%s3447_s3 + $0x68] sm:$0xff]  ;;  %v850_v61 = vld [vmem:[%s3447_s3 + $0x30] sm:$0xff]  ;;  %v3200_v31 = vpop.permute.xlu0 %908 }
 0x10d   : > { %v2071_v35 = vpack.c.bf16 %v2267_v15, %v2271_v6  ;;  %v2273_v48 = vpop.eup %2272  ;;  %v848_v15 = vld [vmem:[%s3447_s3 + $0x20] sm:$0xff]  ;;  %v859_v6 = vld [vmem:[%s3447_s3 + $0x78] sm:$0xff] }
 0x10e   : > { %1822 = vperm.xlu1 %2223, %v1768_v58   ;;  %v682_v25 = vadd.f32 %v650_v54, %v536_v10  ;;  %v683_v47 = vadd.f32 %v651_v42, %v537_v46  ;;  %v2275_v26 = vpop.eup %2274  ;;  %v851_v58 = vld [vmem:[%s3447_s3 + $0x38] sm:$0xff] }
 0x10f   : > { %2072 = vmatprep.subr.bf16.mxu0 %v2071_v35  ;;  %2152 = vmatprep.subr.bf16.mxu1 %v2071_v35 }
 0x110   : > { %v763_v38 = vpop.permute.xlu1 %762  ;;  %2074 = vmatpush1.bf16.msra.mxu0 %v2073_v32  ;;  %2160 = vmatpush1.bf16.msra.mxu1 %v2073_v32 }
 0x111   : > { %v804_v34 = vadd.f32 %v763_v38, %v676_v21  ;;  %v805_v40 = vadd.f32 %v763_v38, %v677_v36  ;;  %v919_v36 = vpop.permute.xlu0 %918 }
 0x112   : > { %1832 = vperm.xlu1 %2223, %v1770_v39  }
 0x113   : > { %2276 = vtanh.f32 %v804_v34 }
 0x114   : > { %2278 = vtanh.f32 %v805_v40  ;;  %v773_v43 = vpop.permute.xlu1 %772 }
 0x115   : > { %v808_v16 = vadd.f32 %v773_v43, %v680_v57  ;;  %v809_v14 = vadd.f32 %v773_v43, %v681_v44 }
 0x116   : > { %1842 = vperm.xlu1 %2223, %v1772_v45  }
 0x117   : > { %2280 = vtanh.f32 %v808_v16 }
 0x118   : > { %v778_v29 = vpop.permute.xlu1 %777  ;;  %2282 = vtanh.f32 %v809_v14 }
 0x119   : > { %v810_v49 = vadd.f32 %v778_v29, %v682_v25  ;;  %v811_v51 = vadd.f32 %v778_v29, %v683_v47  ;;  %v929_v25 = vpop.permute.xlu0 %928 }
 0x11a   : > { %1852 = vperm.xlu1 %2223, %v1774_v23  }
 0x11b   : > { %2284 = vtanh.f32 %v810_v49 }
 0x11c   : > { %2286 = vtanh.f32 %v811_v51  ;;  %v884_v27 = vpop.permute.xlu1 %883 }
 0x11d   : > { %v2277_v30 = vpop.eup %2276 }
 0x11e   : > { %v2279_v52 = vpop.eup %2278  ;;  %v2077_v55 = vpack.c.bf16 %v2273_v48, %v2277_v30 }
 0x11f   : > { %v2075_v56 = vpack.c.bf16 %v2275_v26, %v2279_v52 }
 0x120   : > { %v894_v32 = vpop.permute.xlu1 %893 }
 0x121   : > { %2076 = vmatprep.subr.bf16.mxu0 %v2075_v56  ;;  %2153 = vmatprep.subr.bf16.mxu1 %v2075_v56  ;;  %v2281_v59 = vpop.eup %2280 }
 0x122   : > { %2078 = vmatpush1.bf16.msra.mxu0 %v2077_v55  ;;  %2161 = vmatpush1.bf16.msra.mxu1 %v2077_v55  ;;  %v2283_v50 = vpop.eup %2282 }
 0x124   : > { %v3198_v35 = vpop.permute.xlu1 %903 }
 0x125   : > { %v2285_v2 = vpop.eup %2284 }
 0x126   : > { %v2287_v60 = vpop.eup %2286  ;;  %v2081_v63 = vpack.c.bf16 %v2285_v2, %v2281_v59 }
 0x127   : > { %v2079_v1 = vpack.c.bf16 %v2287_v60, %v2283_v50 }
 0x128   : > { %v3202_v21 = vpop.permute.xlu1 %913 }
 0x129   : > { %2080 = vmatprep.subr.bf16.mxu0 %v2079_v1  ;;  %2154 = vmatprep.subr.bf16.mxu1 %v2079_v1 }
 0x12a   : > { %2082 = vmatpush1.bf16.msra.mxu0 %v2081_v63  ;;  %2162 = vmatpush1.bf16.msra.mxu1 %v2081_v63 }
 0x12c   : > { %v924_v42 = vpop.permute.xlu1 %923 }
 0x12d   : > { %1021 = vmatmul.mubr.f32.vlgmr.msra.gmra.mrb[0].mxu0 %v844_v4  ;;  %1069 = vmatmul.mubr.f32.vlgmr.msra.gmra.mrb[0].mxu1 %v852_v53 }
 0x12e   : > { %1026 = vmatprep.mubr.f32.mxu0 %v2546_v22  ;;  %1074 = vmatprep.mubr.f32.mxu1 %v2546_v22 }
 0x130   : > { %v934_v52 = vpop.permute.xlu1 %933 }
 0x131   : > { %1027 = vmatmul.mubr.f32.gmra.mrb[2].mxu0 %v845_v8  ;;  %1075 = vmatmul.mubr.f32.gmra.mrb[2].mxu1 %v853_v11  ;;  %v939_v11 = vpop.permute.xlu0 %938 }
 0x132   : > { %1032 = vmatprep.mubr.f32.mxu0 %v2546_v22  ;;  %1080 = vmatprep.mubr.f32.mxu1 %v2546_v22 }
 0x135   : > { %1033 = vmatmul.mubr.f32.gmra.mrb[4].mxu0 %v846_v12  ;;  %1081 = vmatmul.mubr.f32.gmra.mrb[4].mxu1 %v854_v0 }
 0x136   : > { %1038 = vmatprep.mubr.f32.mxu0 %v2546_v22  ;;  %1086 = vmatprep.mubr.f32.mxu1 %v2546_v22 }
 0x139   : > { %1039 = vmatmul.mubr.f32.gmra.mrb[6].mxu0 %v847_v13  ;;  %1087 = vmatmul.mubr.f32.gmra.mrb[6].mxu1 %v855_v5 }
 0x13a   : > { %1044 = vmatprep.mubr.f32.mxu0 %v2546_v22  ;;  %1092 = vmatprep.mubr.f32.mxu1 %v2546_v22 }
 0x13d   : > { %1045 = vmatmul.mubr.f32.gmra.mrb[8].mxu0 %v848_v15  ;;  %1093 = vmatmul.mubr.f32.gmra.mrb[8].mxu1 %v856_v17 }
 0x13e   : > { %1050 = vmatprep.mubr.f32.mxu0 %v2546_v22  ;;  %1098 = vmatprep.mubr.f32.mxu1 %v2546_v22 }
 0x141   : > { %1051 = vmatmul.mubr.f32.gmra.mrb[10].mxu0 %v849_v18  ;;  %1099 = vmatmul.mubr.f32.gmra.mrb[10].mxu1 %v857_v19 }
 0x142   : > { %1056 = vmatprep.mubr.f32.mxu0 %v2546_v22  ;;  %1104 = vmatprep.mubr.f32.mxu1 %v2546_v22 }
 0x145   : > { %1057 = vmatmul.mubr.f32.gmra.mrb[12].mxu0 %v850_v61  ;;  %1105 = vmatmul.mubr.f32.gmra.mrb[12].mxu1 %v858_v20 }
 0x146   : > { %1062 = vmatprep.mubr.f32.mxu0 %v2546_v22  ;;  %1110 = vmatprep.mubr.f32.mxu1 %v2546_v22 }
 0x149   : > { %1063 = vmatmul.mubr.f32.gmra.mrb[14].mxu0 %v851_v58  ;;  %1111 = vmatmul.mubr.f32.gmra.mrb[14].mxu1 %v859_v6 }
 0x14a   : > { %1325 = vmatprep.mubr.f32.mxu1 %v2546_v22  ;;  %1630 = vmatprep.mubr.f32.mxu0 %v2546_v22 }
 0x200   : > { %v1022_v37 = vpop.f32.mrb[0].mxu0  ;;  %v1070_v38 = vpop.f32.mrb[0].mxu1 }
 0x201   : > { %v1023_v39 = vadd.f32 %v1022_v37, %v879_v24  ;;  %v1071_v7 = vadd.f32 %v1070_v38, %v919_v36  ;;  %v1024_v34 = vpop.f32.mrb[1].mxu0  ;;  %v1072_v40 = vpop.f32.mrb[1].mxu1 }
 0x202   : > { %v1025_v41 = vadd.f32 %v1024_v34, %v879_v24  ;;  %v1073_v54 = vadd.f32 %v1072_v40, %v919_v36 }
 0x203   : > { %2288 = vtanh.f32 %v1023_v39 }
 0x204   : > { %2290 = vtanh.f32 %v1071_v7  ;;  %v1028_v57 = vpop.f32.mrb[2].mxu0  ;;  %v1076_v43 = vpop.f32.mrb[2].mxu1 }
 0x205   : > { %2292 = vtanh.f32 %v1025_v41  ;;  %v1029_v44 = vadd.f32 %v1028_v57, %v884_v27  ;;  %v1077_v45 = vadd.f32 %v1076_v43, %v924_v42  ;;  %v1030_v10 = vpop.f32.mrb[3].mxu0  ;;  %v1078_v46 = vpop.f32.mrb[3].mxu1 }
 0x206   : > { %2294 = vtanh.f32 %v1073_v54  ;;  %v1031_v16 = vadd.f32 %v1030_v10, %v884_v27  ;;  %v1079_v14 = vadd.f32 %v1078_v46, %v924_v42  ;;  %v944_v27 = vpop.permute.xlu1 %943 }
 0x207   : > { %2296 = vtanh.f32 %v1029_v44  ;;  %v949_v44 = vpop.permute.xlu0 %948 }
 0x208   : > { %2298 = vtanh.f32 %v1077_v45  ;;  %v1034_v47 = vpop.f32.mrb[4].mxu0  ;;  %v1082_v29 = vpop.f32.mrb[4].mxu1 }
 0x209   : > { %2300 = vtanh.f32 %v1031_v16  ;;  %v1035_v23 = vadd.f32 %v1034_v47, %v889_v28  ;;  %v1083_v49 = vadd.f32 %v1082_v29, %v929_v25  ;;  %v1036_v51 = vpop.f32.mrb[5].mxu0  ;;  %v1084_v48 = vpop.f32.mrb[5].mxu1 }
 0x20a   : > { %2302 = vtanh.f32 %v1079_v14  ;;  %v1037_v26 = vadd.f32 %v1036_v51, %v889_v28  ;;  %v1085_v30 = vadd.f32 %v1084_v48, %v929_v25 }
 0x20b   : > { %2304 = vtanh.f32 %v1035_v23 }
 0x20c   : > { %2306 = vtanh.f32 %v1083_v49  ;;  %v1040_v55 = vpop.f32.mrb[6].mxu0  ;;  %v1088_v56 = vpop.f32.mrb[6].mxu1 }
 0x20d   : > { %v2289_v59 = vpop.eup %2288  ;;  %2308 = vtanh.f32 %v1037_v26  ;;  %v1041_v50 = vadd.f32 %v1040_v55, %v894_v32  ;;  %v1089_v2 = vadd.f32 %v1088_v56, %v934_v52  ;;  %v1042_v60 = vpop.f32.mrb[7].mxu0 }
 0x20e   : > { %v1090_v63 = vpop.f32.mrb[7].mxu1  ;;  %v3204_v1 = vpop.eup %2290  ;;  %2310 = vtanh.f32 %v1085_v30  ;;  %v1043_v4 = vadd.f32 %v1042_v60, %v894_v32 }
 0x20f   : > { %v1091_v53 = vadd.f32 %v1090_v63, %v934_v52  ;;  %v2293_v8 = vpop.eup %2292  ;;  %2312 = vtanh.f32 %v1041_v50  ;;  %v954_v26 = vpop.permute.xlu1 %953 }
 0x210   : > { %v3206_v12 = vpop.eup %2294  ;;  %2314 = vtanh.f32 %v1089_v2  ;;  %v1046_v0 = vpop.f32.mrb[8].mxu0 }
 0x211   : > { %v1094_v13 = vpop.f32.mrb[8].mxu1  ;;  %v2297_v5 = vpop.eup %2296  ;;  %2316 = vtanh.f32 %v1043_v4  ;;  %v1047_v15 = vadd.f32 %v1046_v0, %v3196_v33 }
 0x212   : > { %v1095_v17 = vadd.f32 %v1094_v13, %v939_v11  ;;  %v1048_v18 = vpop.f32.mrb[9].mxu0  ;;  %v1096_v19 = vpop.f32.mrb[9].mxu1  ;;  %2318 = vtanh.f32 %v1091_v53  ;;  %v2085_v6 = vpack.c.bf16 %v2297_v5, %v2289_v59 }
 0x213   : > { %v3209_v61 = vpop.eup %2298  ;;  %v1049_v20 = vadd.f32 %v1048_v18, %v3196_v33  ;;  %v1097_v58 = vadd.f32 %v1096_v19, %v939_v11  ;;  %2320 = vtanh.f32 %v1047_v15 }
 0x214   : > { %v2301_v24 = vpop.eup %2300  ;;  %v2101_v28 = vpack.c.bf16 %v3209_v61, %v3204_v1  ;;  %2322 = vtanh.f32 %v1095_v17  ;;  %v1052_v36 = vpop.f32.mrb[10].mxu0  ;;  %v1151_v1 = vld [vmem:[%s3449_s5 + $0x10] sm:$0xff]  ;;  %v1152_v61 = vld [vmem:[%s3449_s5 + $0x18] sm:$0xff] }
 0x215   : > { %v3214_v32 = vpop.eup %2302  ;;  %v1100_v37 = vpop.f32.mrb[10].mxu1  ;;  %v2083_v38 = vpack.c.bf16 %v2301_v24, %v2293_v8  ;;  %2324 = vtanh.f32 %v1049_v20  ;;  %v1053_v7 = vadd.f32 %v1052_v36, %v3198_v35 }
 0x216   : > { %v2305_v39 = vpop.eup %2304  ;;  %v1101_v34 = vadd.f32 %v1100_v37, %v944_v27  ;;  %v1054_v33 = vpop.f32.mrb[11].mxu0  ;;  %v2099_v41 = vpack.c.bf16 %v3214_v32, %v3206_v12  ;;  %2326 = vtanh.f32 %v1097_v58  ;;  %v1150_v12 = vld [vmem:[%s3449_s5 + $0x8] sm:$0xff] }
 0x217   : > { %v1102_v40 = vpop.f32.mrb[11].mxu1  ;;  %v3219_v54 = vpop.eup %2306  ;;  %v1055_v42 = vadd.f32 %v1054_v33, %v3198_v35  ;;  %2084 = vmatprep.subr.bf16.mxu1 %v2083_v38  ;;  %2328 = vtanh.f32 %v1053_v7  ;;  %v1154_v32 = vld [vmem:[%s3449_s5 + $0x28] sm:$0xff] }
 0x218   : > { %v1103_v57 = vadd.f32 %v1102_v40, %v944_v27  ;;  %v2309_v43 = vpop.eup %2308  ;;  %2086 = vmatpush1.bf16.msra.mxu1 %v2085_v6  ;;  %2330 = vtanh.f32 %v1101_v34  ;;  %v1058_v10 = vpop.f32.mrb[12].mxu0 }
 0x219   : > { %v3222_v45 = vpop.eup %2310  ;;  %v1106_v46 = vpop.f32.mrb[12].mxu1  ;;  %2332 = vtanh.f32 %v1055_v42  ;;  %v1059_v14 = vadd.f32 %v1058_v10, %v3200_v31  ;;  %v1149_v42 = vld [vmem:[%s3449_s5] sm:$0xff]  ;;  %v1160_v10 = vld [vmem:[%s3449_s5 + $0x58] sm:$0xff] }
 0x21a   : > { %v2313_v16 = vpop.eup %2312  ;;  %v1107_v25 = vadd.f32 %v1106_v46, %v949_v44  ;;  %v1060_v47 = vpop.f32.mrb[13].mxu0  ;;  %2334 = vtanh.f32 %v1103_v57  ;;  %v1156_v57 = vld [vmem:[%s3449_s5 + $0x38] sm:$0xff]  ;;  %v1161_v46 = vld [vmem:[%s3449_s5 + $0x60] sm:$0xff] }
 0x21b   : > { %v1108_v29 = vpop.f32.mrb[13].mxu1  ;;  %v2315_v23 = vpop.eup %2314  ;;  %v1061_v35 = vadd.f32 %v1060_v47, %v3200_v31  ;;  %v2089_v51 = vpack.c.bf16 %v2313_v16, %v2305_v39  ;;  %2336 = vtanh.f32 %v1059_v14  ;;  %v1162_v16 = vld [vmem:[%s3449_s5 + $0x68] sm:$0xff]  ;;  %v1163_v14 = vld [vmem:[%s3449_s5 + $0x70] sm:$0xff] }
 0x21c   : > { %v1109_v49 = vadd.f32 %v1108_v29, %v949_v44  ;;  %v2317_v48 = vpop.eup %2316  ;;  %v2105_v30 = vpack.c.bf16 %v2315_v23, %v3219_v54  ;;  %2338 = vtanh.f32 %v1107_v25  ;;  %v1064_v55 = vpop.f32.mrb[14].mxu0  ;;  %v1158_v44 = vld [vmem:[%s3449_s5 + $0x48] sm:$0xff]  ;;  %v1164_v25 = vld [vmem:[%s3449_s5 + $0x78] sm:$0xff] }
 0x21d   : > { %v2319_v52 = vpop.eup %2318  ;;  %v1112_v56 = vpop.f32.mrb[14].mxu1  ;;  %v2087_v59 = vpack.c.bf16 %v2317_v48, %v2309_v43  ;;  %2340 = vtanh.f32 %v1061_v35  ;;  %v1065_v2 = vadd.f32 %v1064_v55, %v3202_v21  ;;  %v1157_v43 = vld [vmem:[%s3449_s5 + $0x40] sm:$0xff] }
 0x21e   : > { %v2321_v50 = vpop.eup %2320  ;;  %v1113_v60 = vadd.f32 %v1112_v56, %v954_v26  ;;  %v1066_v63 = vpop.f32.mrb[15].mxu0  ;;  %v2103_v31 = vpack.c.bf16 %v2319_v52, %v3222_v45  ;;  %2342 = vtanh.f32 %v1109_v49  ;;  %v1159_v45 = vld [vmem:[%s3449_s5 + $0x50] sm:$0xff] }
 0x21f   : > { %v1114_v4 = vpop.f32.mrb[15].mxu1  ;;  %v2323_v53 = vpop.eup %2322  ;;  %v1067_v8 = vadd.f32 %v1066_v63, %v3202_v21  ;;  %2088 = vmatprep.subr.bf16.mxu1 %v2087_v59  ;;  %2344 = vtanh.f32 %v1065_v2 }
 0x220   : > { %v1115_v11 = vadd.f32 %v1114_v4, %v954_v26  ;;  %v2325_v0 = vpop.eup %2324  ;;  %2090 = vmatpush1.bf16.msra.mxu1 %v2089_v51  ;;  %2346 = vtanh.f32 %v1113_v60  ;;  %v1184_v47 = vpop.permute.xlu0 %1183 }
 0x221   : > { %v2327_v13 = vpop.eup %2326  ;;  %2348 = vtanh.f32 %v1067_v8  ;;  %v1189_v51 = vpop.permute.xlu1 %1188 }
 0x222   : > { %v2329_v5 = vpop.eup %2328  ;;  %2350 = vtanh.f32 %v1115_v11 }
 0x223   : > { %v2331_v15 = vpop.eup %2330  ;;  %v2093_v17 = vpack.c.bf16 %v2329_v5, %v2321_v50 }
 0x224   : > { %v2333_v18 = vpop.eup %2332  ;;  %v2109_v19 = vpack.c.bf16 %v2331_v15, %v2323_v53  ;;  %v1194_v55 = vpop.permute.xlu0 %1193 }
 0x225   : > { %v2335_v20 = vpop.eup %2334  ;;  %v2091_v58 = vpack.c.bf16 %v2333_v18, %v2325_v0  ;;  %v1199_v60 = vpop.permute.xlu1 %1198 }
 0x226   : > { %v2337_v6 = vpop.eup %2336  ;;  %v2107_v24 = vpack.c.bf16 %v2335_v20, %v2327_v13 }
 0x227   : > { %v2339_v27 = vpop.eup %2338  ;;  %2092 = vmatprep.subr.bf16.mxu1 %v2091_v58 }
 0x228   : > { %v2341_v21 = vpop.eup %2340  ;;  %2094 = vmatpush1.bf16.msra.mxu1 %v2093_v17  ;;  %v1204_v0 = vpop.permute.xlu0 %1203 }
 0x229   : > { %v2343_v36 = vpop.eup %2342 }
 0x22a   : > { %v2345_v37 = vpop.eup %2344 }
 0x22b   : > { %v2347_v38 = vpop.eup %2346  ;;  %v2097_v39 = vpack.c.bf16 %v2345_v37, %v2337_v6  ;;  %v1209_v6 = vpop.permute.xlu1 %1208 }
 0x22c   : > { %v2349_v7 = vpop.eup %2348  ;;  %v2113_v34 = vpack.c.bf16 %v2347_v38, %v2339_v27 }
 0x22d   : > { %v2351_v33 = vpop.eup %2350  ;;  %v2095_v40 = vpack.c.bf16 %v2349_v7, %v2341_v21 }
 0x22e   : > { %v2111_v54 = vpack.c.bf16 %v2351_v33, %v2343_v36 }
 0x22f   : > { %2096 = vmatprep.subr.bf16.mxu1 %v2095_v40 }
 0x230   : > { %2098 = vmatpush1.bf16.msra.mxu1 %v2097_v39  ;;  %v1214_v39 = vpop.permute.xlu0 %1213 }
 0x231   : > { %2100 = vmatprep.subr.bf16.mxu1 %v2099_v41  ;;  %v1155_v41 = vld [vmem:[%s3449_s5 + $0x30] sm:$0xff] }
 0x234   : > { %2102 = vmatpush1.bf16.msra.mxu1 %v2101_v28  ;;  %v1153_v28 = vld [vmem:[%s3449_s5 + $0x20] sm:$0xff] }
 0x235   : > { %2104 = vmatprep.subr.bf16.mxu1 %v2103_v31 }
 0x238   : > { %2106 = vmatpush1.bf16.msra.mxu1 %v2105_v30 }
 0x239   : > { %2108 = vmatprep.subr.bf16.mxu1 %v2107_v24 }
 0x23c   : > { %2110 = vmatpush1.bf16.msra.mxu1 %v2109_v19 }
 0x23d   : > { %2112 = vmatprep.subr.bf16.mxu1 %v2111_v54 }
 0x240   : > { %2114 = vmatpush1.bf16.msra.mxu1 %v2113_v34 }
 0x243   : > { %1326 = vmatmul.mubr.f32.vlgmr.msra.gmra.mrb[16].mxu1 %v1149_v42 }
 0x244   : > { %1331 = vmatprep.mubr.f32.mxu1 %v2546_v22 }
 0x247   : > { %1332 = vmatmul.mubr.f32.gmra.mrb[18].mxu1 %v1150_v12 }
 0x248   : > { %1337 = vmatprep.mubr.f32.mxu1 %v2546_v22 }
 0x24b   : > { %1338 = vmatmul.mubr.f32.gmra.mrb[20].mxu1 %v1151_v1 }
 0x24c   : > { %1343 = vmatprep.mubr.f32.mxu1 %v2546_v22 }
 0x24f   : > { %1344 = vmatmul.mubr.f32.gmra.mrb[22].mxu1 %v1152_v61  ;;  %v1219_v61 = vpop.permute.xlu1 %1218 }
 0x250   : > { %1349 = vmatprep.mubr.f32.mxu1 %v2546_v22 }
 0x253   : > { %1350 = vmatmul.mubr.f32.gmra.mrb[24].mxu1 %v1153_v28 }
 0x254   : > { %1355 = vmatprep.mubr.f32.mxu1 %v2546_v22 }
 0x257   : > { %1356 = vmatmul.mubr.f32.gmra.mrb[26].mxu1 %v1154_v32 }
 0x258   : > { %1361 = vmatprep.mubr.f32.mxu1 %v2546_v22 }
 0x25b   : > { %1362 = vmatmul.mubr.f32.gmra.mrb[28].mxu1 %v1155_v41 }
 0x25c   : > { %1367 = vmatprep.mubr.f32.mxu1 %v2546_v22 }
 0x25f   : > { %1368 = vmatmul.mubr.f32.gmra.mrb[30].mxu1 %v1156_v57 }
 0x260   : > { %1373 = vmatprep.mubr.f32.mxu1 %v2546_v22 }
 0x263   : > { %1374 = vmatmul.mubr.f32.gmra.mrb[32].mxu1 %v1157_v43 }
 0x264   : > { %1379 = vmatprep.mubr.f32.mxu1 %v2546_v22 }
 0x267   : > { %1380 = vmatmul.mubr.f32.gmra.mrb[34].mxu1 %v1158_v44 }
 0x268   : > { %1385 = vmatprep.mubr.f32.mxu1 %v2546_v22 }
 0x26b   : > { %1386 = vmatmul.mubr.f32.gmra.mrb[36].mxu1 %v1159_v45  ;;  %v1224_v45 = vpop.permute.xlu0 %1223 }
 0x26c   : > { %1391 = vmatprep.mubr.f32.mxu1 %v2546_v22 }
 0x26f   : > { %1392 = vmatmul.mubr.f32.gmra.mrb[38].mxu1 %v1160_v10 }
 0x270   : > { %1397 = vmatprep.mubr.f32.mxu1 %v2546_v22 }
 0x273   : > { %1398 = vmatmul.mubr.f32.gmra.mrb[40].mxu1 %v1161_v46 }
 0x274   : > { %1403 = vmatprep.mubr.f32.mxu1 %v2546_v22 }
 0x277   : > { %1404 = vmatmul.mubr.f32.gmra.mrb[42].mxu1 %v1162_v16 }
 0x278   : > { %1409 = vmatprep.mubr.f32.mxu1 %v2546_v22 }
 0x27b   : > { %1410 = vmatmul.mubr.f32.gmra.mrb[44].mxu1 %v1163_v14 }
 0x27c   : > { %1415 = vmatprep.mubr.f32.mxu1 %v2546_v22 }
 0x27f   : > { %1416 = vmatmul.mubr.f32.gmra.mrb[46].mxu1 %v1164_v25 }
 0x316   : > { %v1327_v29 = vpop.f32.mrb[16].mxu1 }
 0x317   : > { %v1328_v23 = vadd.f32 %v1327_v29, %v1184_v47  ;;  %v1329_v35 = vpop.f32.mrb[17].mxu1 }
 0x318   : > { %v1330_v49 = vadd.f32 %v1329_v35, %v1184_v47  ;;  %v1229_v35 = vpop.permute.xlu1 %1228 }
 0x319   : > { %2352 = vtanh.f32 %v1328_v23 }
 0x31a   : > { %v1333_v48 = vpop.f32.mrb[18].mxu1  ;;  %2354 = vtanh.f32 %v1330_v49 }
 0x31b   : > { %v1334_v26 = vadd.f32 %v1333_v48, %v1189_v51  ;;  %v1335_v30 = vpop.f32.mrb[19].mxu1 }
 0x31c   : > { %v1336_v52 = vadd.f32 %v1335_v30, %v1189_v51 }
 0x31d   : > { %2356 = vtanh.f32 %v1334_v26 }
 0x31e   : > { %2358 = vtanh.f32 %v1336_v52  ;;  %v1339_v56 = vpop.f32.mrb[20].mxu1 }
 0x31f   : > { %v1340_v59 = vadd.f32 %v1339_v56, %v1194_v55  ;;  %v1341_v50 = vpop.f32.mrb[21].mxu1 }
 0x320   : > { %v1342_v2 = vadd.f32 %v1341_v50, %v1194_v55  ;;  %v1234_v55 = vpop.permute.xlu0 %1233 }
 0x321   : > { %2360 = vtanh.f32 %v1340_v59 }
 0x322   : > { %v1345_v63 = vpop.f32.mrb[22].mxu1  ;;  %2362 = vtanh.f32 %v1342_v2 }
 0x323   : > { %v1346_v4 = vadd.f32 %v1345_v63, %v1199_v60  ;;  %v1347_v31 = vpop.f32.mrb[23].mxu1  ;;  %v2353_v8 = vpop.eup %2352 }
 0x324   : > { %v1348_v53 = vadd.f32 %v1347_v31, %v1199_v60  ;;  %v2355_v11 = vpop.eup %2354 }
 0x325   : > { %2364 = vtanh.f32 %v1346_v4 }
 0x326   : > { %2366 = vtanh.f32 %v1348_v53  ;;  %v1351_v13 = vpop.f32.mrb[24].mxu1  ;;  %v1239_v53 = vpop.permute.xlu1 %1238 }
 0x327   : > { %v2357_v5 = vpop.eup %2356  ;;  %v1352_v15 = vadd.f32 %v1351_v13, %v1204_v0  ;;  %v1353_v17 = vpop.f32.mrb[25].mxu1 }
 0x328   : > { %v2359_v18 = vpop.eup %2358  ;;  %v1354_v19 = vadd.f32 %v1353_v17, %v1204_v0  ;;  %v2117_v20 = vpack.c.bf16 %v2357_v5, %v2353_v8  ;;  %v1244_v17 = vpop.permute.xlu0 %1243 }
 0x329   : > { %v2115_v58 = vpack.c.bf16 %v2359_v18, %v2355_v11  ;;  %2368 = vtanh.f32 %v1352_v15 }
 0x32a   : > { %v1357_v24 = vpop.f32.mrb[26].mxu1  ;;  %2370 = vtanh.f32 %v1354_v19 }
 0x32b   : > { %v1358_v27 = vadd.f32 %v1357_v24, %v1209_v6  ;;  %v1359_v21 = vpop.f32.mrb[27].mxu1  ;;  %2116 = vmatprep.subr.bf16.mxu0 %v2115_v58  ;;  %v2361_v37 = vpop.eup %2360 }
 0x32c   : > { %v1360_v36 = vadd.f32 %v1359_v21, %v1209_v6  ;;  %2118 = vmatpush1.bf16.msra.mxu0 %v2117_v20  ;;  %v2363_v38 = vpop.eup %2362 }
 0x32d   : > { %2372 = vtanh.f32 %v1358_v27 }
 0x32e   : > { %2374 = vtanh.f32 %v1360_v36  ;;  %v1363_v7 = vpop.f32.mrb[28].mxu1  ;;  %v1249_v36 = vpop.permute.xlu1 %1248 }
 0x32f   : > { %v2365_v34 = vpop.eup %2364  ;;  %v1364_v33 = vadd.f32 %v1363_v7, %v1214_v39  ;;  %v1365_v40 = vpop.f32.mrb[29].mxu1 }
 0x330   : > { %v2367_v54 = vpop.eup %2366  ;;  %v1366_v42 = vadd.f32 %v1365_v40, %v1214_v39  ;;  %v2121_v12 = vpack.c.bf16 %v2365_v34, %v2361_v37  ;;  %v1254_v40 = vpop.permute.xlu0 %1253 }
 0x331   : > { %v2119_v1 = vpack.c.bf16 %v2367_v54, %v2363_v38  ;;  %2376 = vtanh.f32 %v1364_v33 }
 0x332   : > { %v1369_v28 = vpop.f32.mrb[30].mxu1  ;;  %2378 = vtanh.f32 %v1366_v42 }
 0x333   : > { %v1370_v32 = vadd.f32 %v1369_v28, %v1219_v61  ;;  %v1371_v41 = vpop.f32.mrb[31].mxu1  ;;  %2120 = vmatprep.subr.bf16.mxu0 %v2119_v1  ;;  %v2369_v43 = vpop.eup %2368 }
 0x334   : > { %v1372_v57 = vadd.f32 %v1371_v41, %v1219_v61  ;;  %2122 = vmatpush1.bf16.msra.mxu0 %v2121_v12  ;;  %v2371_v44 = vpop.eup %2370 }
 0x335   : > { %2380 = vtanh.f32 %v1370_v32 }
 0x336   : > { %2382 = vtanh.f32 %v1372_v57  ;;  %v1375_v10 = vpop.f32.mrb[32].mxu1  ;;  %v1259_v57 = vpop.permute.xlu1 %1258 }
 0x337   : > { %v2373_v46 = vpop.eup %2372  ;;  %v1376_v16 = vadd.f32 %v1375_v10, %v1224_v45  ;;  %v1377_v14 = vpop.f32.mrb[33].mxu1 }
 0x338   : > { %v2375_v25 = vpop.eup %2374  ;;  %v1378_v47 = vadd.f32 %v1377_v14, %v1224_v45  ;;  %v2125_v29 = vpack.c.bf16 %v2373_v46, %v2369_v43 }
 0x339   : > { %v2123_v23 = vpack.c.bf16 %v2375_v25, %v2371_v44  ;;  %2384 = vtanh.f32 %v1376_v16 }
 0x33a   : > { %v1381_v49 = vpop.f32.mrb[34].mxu1  ;;  %2386 = vtanh.f32 %v1378_v47 }
 0x33b   : > { %v1382_v51 = vadd.f32 %v1381_v49, %v1229_v35  ;;  %v1383_v48 = vpop.f32.mrb[35].mxu1  ;;  %2124 = vmatprep.subr.bf16.mxu0 %v2123_v23  ;;  %v2377_v30 = vpop.eup %2376 }
 0x33c   : > { %v1384_v26 = vadd.f32 %v1383_v48, %v1229_v35  ;;  %2126 = vmatpush1.bf16.msra.mxu0 %v2125_v29  ;;  %v2379_v52 = vpop.eup %2378 }
 0x33d   : > { %2388 = vtanh.f32 %v1382_v51 }
 0x33e   : > { %2390 = vtanh.f32 %v1384_v26  ;;  %v1387_v56 = vpop.f32.mrb[36].mxu1 }
 0x33f   : > { %v2381_v59 = vpop.eup %2380  ;;  %v1388_v50 = vadd.f32 %v1387_v56, %v1234_v55  ;;  %v1389_v2 = vpop.f32.mrb[37].mxu1  ;;  %v1457_v56 = vld [vmem:[%s3451_s7 + $0x18] sm:$0xff] }
 0x340   : > { %v2383_v60 = vpop.eup %2382  ;;  %v1390_v63 = vadd.f32 %v1389_v2, %v1234_v55  ;;  %v2129_v4 = vpack.c.bf16 %v2381_v59, %v2377_v30  ;;  %v1454_v30 = vld [vmem:[%s3451_s7] sm:$0xff]  ;;  %v1456_v55 = vld [vmem:[%s3451_s7 + $0x10] sm:$0xff] }
 0x341   : > { %v2127_v31 = vpack.c.bf16 %v2383_v60, %v2379_v52  ;;  %2392 = vtanh.f32 %v1388_v50  ;;  %v1455_v52 = vld [vmem:[%s3451_s7 + $0x8] sm:$0xff]  ;;  %v1458_v59 = vld [vmem:[%s3451_s7 + $0x20] sm:$0xff]  ;;  %v1460_v2 = vld [vmem:[%s3451_s7 + $0x30] sm:$0xff] }
 0x342   : > { %v1393_v8 = vpop.f32.mrb[38].mxu1  ;;  %2394 = vtanh.f32 %v1390_v63  ;;  %v1459_v50 = vld [vmem:[%s3451_s7 + $0x28] sm:$0xff]  ;;  %v1461_v60 = vld [vmem:[%s3451_s7 + $0x38] sm:$0xff]  ;;  %v1462_v63 = vld [vmem:[%s3451_s7 + $0x40] sm:$0xff] }
 0x343   : > { %v1394_v11 = vadd.f32 %v1393_v8, %v1239_v53  ;;  %v1395_v0 = vpop.f32.mrb[39].mxu1  ;;  %2128 = vmatprep.subr.bf16.mxu0 %v2127_v31  ;;  %v2385_v5 = vpop.eup %2384  ;;  %v1464_v31 = vld [vmem:[%s3451_s7 + $0x50] sm:$0xff]  ;;  %v1466_v8 = vld [vmem:[%s3451_s7 + $0x60] sm:$0xff] }
 0x344   : > { %v1396_v13 = vadd.f32 %v1395_v0, %v1239_v53  ;;  %2130 = vmatpush1.bf16.msra.mxu0 %v2129_v4  ;;  %v2387_v15 = vpop.eup %2386  ;;  %v1463_v4 = vld [vmem:[%s3451_s7 + $0x48] sm:$0xff]  ;;  %v1465_v53 = vld [vmem:[%s3451_s7 + $0x58] sm:$0xff]  ;;  %v1468_v0 = vld [vmem:[%s3451_s7 + $0x70] sm:$0xff] }
 0x345   : > { %2396 = vtanh.f32 %v1394_v11  ;;  %v1467_v11 = vld [vmem:[%s3451_s7 + $0x68] sm:$0xff] }
 0x346   : > { %2398 = vtanh.f32 %v1396_v13  ;;  %v1399_v18 = vpop.f32.mrb[40].mxu1  ;;  %v1469_v13 = vld [vmem:[%s3451_s7 + $0x78] sm:$0xff] }
 0x347   : > { %v2389_v19 = vpop.eup %2388  ;;  %v1400_v20 = vadd.f32 %v1399_v18, %v1244_v17  ;;  %v1401_v58 = vpop.f32.mrb[41].mxu1 }
 0x348   : > { %v2391_v6 = vpop.eup %2390  ;;  %v1402_v24 = vadd.f32 %v1401_v58, %v1244_v17  ;;  %v2133_v27 = vpack.c.bf16 %v2389_v19, %v2385_v5  ;;  %v1489_v5 = vpop.permute.xlu0 %1488 }
 0x349   : > { %v2131_v21 = vpack.c.bf16 %v2391_v6, %v2387_v15  ;;  %2400 = vtanh.f32 %v1400_v20  ;;  %v1494_v15 = vpop.permute.xlu1 %1493 }
 0x34a   : > { %v1405_v37 = vpop.f32.mrb[42].mxu1  ;;  %2402 = vtanh.f32 %v1402_v24 }
 0x34b   : > { %v1406_v38 = vadd.f32 %v1405_v37, %v1249_v36  ;;  %v1407_v39 = vpop.f32.mrb[43].mxu1  ;;  %2132 = vmatprep.subr.bf16.mxu0 %v2131_v21  ;;  %v2393_v34 = vpop.eup %2392 }
 0x34c   : > { %v1408_v7 = vadd.f32 %v1407_v39, %v1249_v36  ;;  %2134 = vmatpush1.bf16.msra.mxu0 %v2133_v27  ;;  %v2395_v33 = vpop.eup %2394  ;;  %v1499_v17 = vpop.permute.xlu0 %1498 }
 0x34d   : > { %2404 = vtanh.f32 %v1406_v38  ;;  %v1504_v18 = vpop.permute.xlu1 %1503 }
 0x34e   : > { %2406 = vtanh.f32 %v1408_v7  ;;  %v1411_v54 = vpop.f32.mrb[44].mxu1 }
 0x34f   : > { %v2397_v42 = vpop.eup %2396  ;;  %v1412_v12 = vadd.f32 %v1411_v54, %v1254_v40  ;;  %v1413_v1 = vpop.f32.mrb[45].mxu1 }
 0x350   : > { %v2399_v61 = vpop.eup %2398  ;;  %v1414_v28 = vadd.f32 %v1413_v1, %v1254_v40  ;;  %v2137_v32 = vpack.c.bf16 %v2397_v42, %v2393_v34  ;;  %v1509_v19 = vpop.permute.xlu0 %1508 }
 0x351   : > { %v2135_v41 = vpack.c.bf16 %v2399_v61, %v2395_v33  ;;  %2408 = vtanh.f32 %v1412_v12  ;;  %v1514_v20 = vpop.permute.xlu1 %1513 }
 0x352   : > { %v1417_v43 = vpop.f32.mrb[46].mxu1  ;;  %2410 = vtanh.f32 %v1414_v28 }
 0x353   : > { %v1418_v44 = vadd.f32 %v1417_v43, %v1259_v57  ;;  %v1419_v45 = vpop.f32.mrb[47].mxu1  ;;  %2136 = vmatprep.subr.bf16.mxu0 %v2135_v41  ;;  %v2401_v46 = vpop.eup %2400 }
 0x354   : > { %v1420_v10 = vadd.f32 %v1419_v45, %v1259_v57  ;;  %2138 = vmatpush1.bf16.msra.mxu0 %v2137_v32  ;;  %v2403_v16 = vpop.eup %2402  ;;  %v3362_v58 = vpop.permute.xlu0 %1518 }
 0x355   : > { %2412 = vtanh.f32 %v1418_v44  ;;  %v3364_v6 = vpop.permute.xlu1 %1523 }
 0x356   : > { %2414 = vtanh.f32 %v1420_v10 }
 0x357   : > { %v2405_v14 = vpop.eup %2404 }
 0x358   : > { %v2407_v25 = vpop.eup %2406  ;;  %v2141_v47 = vpack.c.bf16 %v2405_v14, %v2401_v46  ;;  %v1778_v24 = vpop.permute.xlu0 %1777 }
 0x359   : > { %v2139_v29 = vpack.c.bf16 %v2407_v25, %v2403_v16  ;;  %v1783_v21 = vpop.permute.xlu1 %1782 }
 0x35b   : > { %2140 = vmatprep.subr.bf16.mxu0 %v2139_v29  ;;  %v2409_v23 = vpop.eup %2408 }
 0x35c   : > { %2142 = vmatpush1.bf16.msra.mxu0 %v2141_v47  ;;  %v2411_v35 = vpop.eup %2410  ;;  %v3366_v39 = vpop.permute.xlu0 %1528 }
 0x35d   : > { %v1788_v40 = vpop.permute.xlu1 %1787 }
 0x35f   : > { %v2413_v49 = vpop.eup %2412 }
 0x360   : > { %v2415_v51 = vpop.eup %2414  ;;  %v2145_v48 = vpack.c.bf16 %v2413_v49, %v2409_v23  ;;  %v3368_v61 = vpop.permute.xlu0 %1533 }
 0x361   : > { %v2143_v26 = vpack.c.bf16 %v2415_v51, %v2411_v35  ;;  %v1793_v32 = vpop.permute.xlu1 %1792 }
 0x363   : > { %2144 = vmatprep.subr.bf16.mxu0 %v2143_v26 }
 0x364   : > { %2146 = vmatpush1.bf16.msra.mxu0 %v2145_v48  ;;  %v3370_v16 = vpop.permute.xlu0 %1538 }
 0x365   : > { %v1798_v49 = vpop.permute.xlu1 %1797 }
 0x367   : > { %1631 = vmatmul.mubr.f32.vlgmr.msra.gmra.mrb[16].mxu0 %v1454_v30 }
 0x368   : > { %1636 = vmatprep.mubr.f32.mxu0 %v2546_v22 }
 0x36b   : > { %1637 = vmatmul.mubr.f32.gmra.mrb[18].mxu0 %v1455_v52 }
 0x36c   : > { %1642 = vmatprep.mubr.f32.mxu0 %v2546_v22 }
 0x36f   : > { %1643 = vmatmul.mubr.f32.gmra.mrb[20].mxu0 %v1456_v55 }
 0x370   : > { %1648 = vmatprep.mubr.f32.mxu0 %v2546_v22 }
 0x373   : > { %1649 = vmatmul.mubr.f32.gmra.mrb[22].mxu0 %v1457_v56 }
 0x374   : > { %1654 = vmatprep.mubr.f32.mxu0 %v2546_v22 }
 0x377   : > { %1655 = vmatmul.mubr.f32.gmra.mrb[24].mxu0 %v1458_v59 }
 0x378   : > { %1660 = vmatprep.mubr.f32.mxu0 %v2546_v22 }
 0x37b   : > { %1661 = vmatmul.mubr.f32.gmra.mrb[26].mxu0 %v1459_v50 }
 0x37c   : > { %1666 = vmatprep.mubr.f32.mxu0 %v2546_v22 }
 0x37f   : > { %1667 = vmatmul.mubr.f32.gmra.mrb[28].mxu0 %v1460_v2 }
 0x380   : > { %1672 = vmatprep.mubr.f32.mxu0 %v2546_v22 }
 0x383   : > { %1673 = vmatmul.mubr.f32.gmra.mrb[30].mxu0 %v1461_v60 }
 0x384   : > { %1678 = vmatprep.mubr.f32.mxu0 %v2546_v22 }
 0x387   : > { %1679 = vmatmul.mubr.f32.gmra.mrb[32].mxu0 %v1462_v63  ;;  %v3372_v63 = vpop.permute.xlu0 %1543 }
 0x388   : > { %1684 = vmatprep.mubr.f32.mxu0 %v2546_v22 }
 0x38b   : > { %1685 = vmatmul.mubr.f32.gmra.mrb[34].mxu0 %v1463_v4 }
 0x38c   : > { %1690 = vmatprep.mubr.f32.mxu0 %v2546_v22 }
 0x38f   : > { %1691 = vmatmul.mubr.f32.gmra.mrb[36].mxu0 %v1464_v31 }
 0x390   : > { %1696 = vmatprep.mubr.f32.mxu0 %v2546_v22 }
 0x393   : > { %1697 = vmatmul.mubr.f32.gmra.mrb[38].mxu0 %v1465_v53 }
 0x394   : > { %1702 = vmatprep.mubr.f32.mxu0 %v2546_v22 }
 0x397   : > { %1703 = vmatmul.mubr.f32.gmra.mrb[40].mxu0 %v1466_v8 }
 0x398   : > { %1708 = vmatprep.mubr.f32.mxu0 %v2546_v22 }
 0x39b   : > { %1709 = vmatmul.mubr.f32.gmra.mrb[42].mxu0 %v1467_v11  ;;  %v1803_v11 = vpop.permute.xlu1 %1802 }
 0x39c   : > { %1714 = vmatprep.mubr.f32.mxu0 %v2546_v22 }
 0x39f   : > { %1715 = vmatmul.mubr.f32.gmra.mrb[44].mxu0 %v1468_v0 }
 0x3a0   : > { %1720 = vmatprep.mubr.f32.mxu0 %v2546_v22 }
 0x3a3   : > { %1721 = vmatmul.mubr.f32.gmra.mrb[46].mxu0 %v1469_v13 }
 0x43a   : > { %v1632_v27 = vpop.f32.mrb[16].mxu0 }
 0x43b   : > { %v1633_v36 = vadd.f32 %v1632_v27, %v1489_v5  ;;  %v1634_v22 = vpop.f32.mrb[17].mxu0 }
 0x43c   : > { %v1635_v37 = vadd.f32 %v1634_v22, %v1489_v5 }
 0x43d   : > { %2416 = vtanh.f32 %v1633_v36 }
 0x43e   : > { %v1638_v38 = vpop.f32.mrb[18].mxu0  ;;  %2418 = vtanh.f32 %v1635_v37 }
 0x43f   : > { %v1639_v7 = vadd.f32 %v1638_v38, %v1494_v15  ;;  %v1640_v34 = vpop.f32.mrb[19].mxu0 }
 0x440   : > { %v1641_v33 = vadd.f32 %v1640_v34, %v1494_v15 }
 0x441   : > { %2420 = vtanh.f32 %v1639_v7 }
 0x442   : > { %2422 = vtanh.f32 %v1641_v33  ;;  %v1644_v54 = vpop.f32.mrb[20].mxu0  ;;  %v1808_v33 = vpop.permute.xlu1 %1807 }
 0x443   : > { %v1645_v42 = vadd.f32 %v1644_v54, %v1499_v17  ;;  %v1646_v12 = vpop.f32.mrb[21].mxu0 }
 0x444   : > { %v1647_v1 = vadd.f32 %v1646_v12, %v1499_v17 }
 0x445   : > { %2424 = vtanh.f32 %v1645_v42 }
 0x446   : > { %2426 = vtanh.f32 %v1647_v1  ;;  %v1650_v28 = vpop.f32.mrb[22].mxu0 }
 0x447   : > { %v1651_v41 = vadd.f32 %v1650_v28, %v1504_v18  ;;  %v1652_v57 = vpop.f32.mrb[23].mxu0  ;;  %v2417_v44 = vpop.eup %2416 }
 0x448   : > { %v1653_v43 = vadd.f32 %v1652_v57, %v1504_v18  ;;  %v2419_v45 = vpop.eup %2418  ;;  %v1855_v29 = vmul.f32 %v2417_v44, %v1778_v24 }
 0x449   : > { %2428 = vtanh.f32 %v1651_v41  ;;  %v1856_v51 = vmul.f32 %v2419_v45, %v1778_v24 }
 0x44a   : > { %2430 = vtanh.f32 %v1653_v43  ;;  %v1656_v10 = vpop.f32.mrb[24].mxu0 }
 0x44b   : > { %v2421_v46 = vpop.eup %2420  ;;  %v1657_v14 = vadd.f32 %v1656_v10, %v1509_v19  ;;  %v1658_v25 = vpop.f32.mrb[25].mxu0 }
 0x44c   : > { %v2423_v47 = vpop.eup %2422  ;;  %v1857_v23 = vmul.f32 %v2421_v46, %v1783_v21  ;;  %v1659_v35 = vadd.f32 %v1658_v25, %v1509_v19  ;;  %v1813_v46 = vpop.permute.xlu1 %1812 }
 0x44d   : > { %v1858_v48 = vmul.f32 %v2423_v47, %v1783_v21  ;;  %2432 = vtanh.f32 %v1657_v14  ;;  %v3376_v21 = vpop.permute.xlu0 %1548 }
 0x44e   : > { %v1887_v26 = vadd.f32 %v1857_v23, %v1855_v29  ;;  %2434 = vtanh.f32 %v1659_v35  ;;  %v1662_v30 = vpop.f32.mrb[26].mxu0 }
 0x44f   : > { %v2425_v52 = vpop.eup %2424  ;;  %v1908_v55 = vadd.f32 %v1858_v48, %v1856_v51  ;;  %v1663_v56 = vadd.f32 %v1662_v30, %v1514_v20  ;;  %v1664_v59 = vpop.f32.mrb[27].mxu0 }
 0x450   : > { %v2427_v50 = vpop.eup %2426  ;;  %v1859_v2 = vmul.f32 %v2425_v52, %v1788_v40  ;;  %v1665_v60 = vadd.f32 %v1664_v59, %v1514_v20 }
 0x451   : > { %v1860_v4 = vmul.f32 %v2427_v50, %v1788_v40  ;;  %2436 = vtanh.f32 %v1663_v56  ;;  %v3382_v43 = vpop.permute.xlu0 %1553 }
 0x452   : > { %v1888_v31 = vadd.f32 %v1887_v26, %v1859_v2  ;;  %2438 = vtanh.f32 %v1665_v60  ;;  %v1668_v53 = vpop.f32.mrb[28].mxu0  ;;  %v1818_v2 = vpop.permute.xlu1 %1817 }
 0x453   : > { %v2429_v8 = vpop.eup %2428  ;;  %v1909_v0 = vadd.f32 %v1908_v55, %v1860_v4  ;;  %v1669_v13 = vadd.f32 %v1668_v53, %v3362_v58  ;;  %v1670_v5 = vpop.f32.mrb[29].mxu0 }
 0x454   : > { %v2431_v15 = vpop.eup %2430  ;;  %v1861_v17 = vmul.f32 %v2429_v8, %v1793_v32  ;;  %v1671_v18 = vadd.f32 %v1670_v5, %v3362_v58 }
 0x455   : > { %v1862_v19 = vmul.f32 %v2431_v15, %v1793_v32  ;;  %2440 = vtanh.f32 %v1669_v13  ;;  %v1559_v26 = vpop.permute.xlu0 %1558 }
 0x456   : > { %v1889_v20 = vadd.f32 %v1888_v31, %v1861_v17  ;;  %2442 = vtanh.f32 %v1671_v18  ;;  %v1674_v24 = vpop.f32.mrb[30].mxu0 }
 0x457   : > { %v2433_v27 = vpop.eup %2432  ;;  %v1910_v36 = vadd.f32 %v1909_v0, %v1862_v19  ;;  %v1675_v22 = vadd.f32 %v1674_v24, %v3364_v6  ;;  %v1676_v37 = vpop.f32.mrb[31].mxu0 }
 0x458   : > { %v2435_v38 = vpop.eup %2434  ;;  %v1863_v7 = vmul.f32 %v2433_v27, %v1798_v49  ;;  %v1677_v34 = vadd.f32 %v1676_v37, %v3364_v6 }
 0x459   : > { %v1864_v40 = vmul.f32 %v2435_v38, %v1798_v49  ;;  %2444 = vtanh.f32 %v1675_v22  ;;  %v1564_v15 = vpop.permute.xlu0 %1563 }
 0x45a   : > { %v1890_v58 = vadd.f32 %v1889_v20, %v1863_v7  ;;  %2446 = vtanh.f32 %v1677_v34  ;;  %v1680_v54 = vpop.f32.mrb[32].mxu0  ;;  %v1823_v20 = vpop.permute.xlu1 %1822 }
 0x45b   : > { %v2437_v42 = vpop.eup %2436  ;;  %v1911_v12 = vadd.f32 %v1910_v36, %v1864_v40  ;;  %v1681_v1 = vadd.f32 %v1680_v54, %v3366_v39  ;;  %v1682_v28 = vpop.f32.mrb[33].mxu0 }
 0x45c   : > { %v2439_v32 = vpop.eup %2438  ;;  %v1865_v41 = vmul.f32 %v2437_v42, %v1803_v11  ;;  %v1683_v57 = vadd.f32 %v1682_v28, %v3366_v39 }
 0x45d   : > { %v1866_v44 = vmul.f32 %v2439_v32, %v1803_v11  ;;  %2448 = vtanh.f32 %v1681_v1  ;;  %v1828_v40 = vpop.permute.xlu0 %1827 }
 0x45e   : > { %v1891_v6 = vadd.f32 %v1890_v58, %v1865_v41  ;;  %2450 = vtanh.f32 %v1683_v57  ;;  %v1686_v45 = vpop.f32.mrb[34].mxu0 }
 0x45f   : > { %v2441_v10 = vpop.eup %2440  ;;  %v1912_v14 = vadd.f32 %v1911_v12, %v1866_v44  ;;  %v1687_v25 = vadd.f32 %v1686_v45, %v3368_v61  ;;  %v1688_v47 = vpop.f32.mrb[35].mxu0 }
 0x460   : > { %v2443_v29 = vpop.eup %2442  ;;  %v1867_v23 = vmul.f32 %v2441_v10, %v1808_v33  ;;  %v1689_v35 = vadd.f32 %v1688_v47, %v3368_v61  ;;  %v1833_v44 = vpop.permute.xlu1 %1832 }
 0x461   : > { %v1868_v49 = vmul.f32 %v2443_v29, %v1808_v33  ;;  %2452 = vtanh.f32 %v1687_v25 }
 0x462   : > { %v1892_v39 = vadd.f32 %v1891_v6, %v1867_v23  ;;  %2454 = vtanh.f32 %v1689_v35  ;;  %v1692_v51 = vpop.f32.mrb[36].mxu0 }
 0x463   : > { %v2445_v48 = vpop.eup %2444  ;;  %v1913_v30 = vadd.f32 %v1912_v14, %v1868_v49  ;;  %v1693_v52 = vadd.f32 %v1692_v51, %v3370_v16  ;;  %v1694_v55 = vpop.f32.mrb[37].mxu0 }
 0x464   : > { %v2447_v56 = vpop.eup %2446  ;;  %v1869_v59 = vmul.f32 %v2445_v48, %v1813_v46  ;;  %v1695_v50 = vadd.f32 %v1694_v55, %v3370_v16 }
 0x465   : > { %v1870_v60 = vmul.f32 %v2447_v56, %v1813_v46  ;;  %2456 = vtanh.f32 %v1693_v52 }
 0x466   : > { %v1893_v4 = vadd.f32 %v1892_v39, %v1869_v59  ;;  %2458 = vtanh.f32 %v1695_v50  ;;  %v1698_v61 = vpop.f32.mrb[38].mxu0  ;;  %v1843_v50 = vpop.permute.xlu1 %1842 }
 0x467   : > { %v2449_v31 = vpop.eup %2448  ;;  %v1914_v53 = vadd.f32 %v1913_v30, %v1870_v60  ;;  %v1699_v8 = vadd.f32 %v1698_v61, %v3372_v63  ;;  %v1700_v11 = vpop.f32.mrb[39].mxu0 }
 0x468   : > { %v2451_v0 = vpop.eup %2450  ;;  %v1871_v13 = vmul.f32 %v2449_v31, %v1818_v2  ;;  %v1701_v5 = vadd.f32 %v1700_v11, %v3372_v63 }
 0x469   : > { %v1872_v17 = vmul.f32 %v2451_v0, %v1818_v2  ;;  %2460 = vtanh.f32 %v1699_v8 }
 0x46a   : > { %v1894_v18 = vadd.f32 %v1893_v4, %v1871_v13  ;;  %2462 = vtanh.f32 %v1701_v5  ;;  %v1704_v16 = vpop.f32.mrb[40].mxu0 }
 0x46b   : > { %v2453_v19 = vpop.eup %2452  ;;  %v1915_v24 = vadd.f32 %v1914_v53, %v1872_v17  ;;  %v1705_v27 = vadd.f32 %v1704_v16, %v3376_v21  ;;  %v1706_v36 = vpop.f32.mrb[41].mxu0 }
 0x46c   : > { %v2455_v22 = vpop.eup %2454  ;;  %v1873_v37 = vmul.f32 %v2453_v19, %v1823_v20  ;;  %v1707_v38 = vadd.f32 %v1706_v36, %v3376_v21 }
 0x46d   : > { %v1874_v7 = vmul.f32 %v2455_v22, %v1823_v20  ;;  %2464 = vtanh.f32 %v1705_v27 }
 0x46e   : > { %v1895_v34 = vadd.f32 %v1894_v18, %v1873_v37  ;;  %2466 = vtanh.f32 %v1707_v38  ;;  %v1710_v63 = vpop.f32.mrb[42].mxu0 }
 0x46f   : > { %v2457_v33 = vpop.eup %2456  ;;  %v1916_v58 = vadd.f32 %v1915_v24, %v1874_v7  ;;  %v1711_v54 = vadd.f32 %v1710_v63, %v3382_v43  ;;  %v1712_v42 = vpop.f32.mrb[43].mxu0  ;;  %v2547_v63 = vmov 1966171168  }
 0x470   : > { %v2459_v12 = vpop.eup %2458  ;;  %v1875_v1 = vmul.f32 %v2457_v33, %v1828_v40  ;;  %v1713_v28 = vadd.f32 %v1712_v42, %v3382_v43  ;;  %v1838_v43 = vpop.permute.xlu0 %1837  ;;  %v1945_v33 = vunpack.c.l.s4 %v2547_v63 }
 0x471   : > { %v1876_v32 = vmul.f32 %v2459_v12, %v1828_v40  ;;  %2468 = vtanh.f32 %v1711_v54 }
 0x472   : > { %v1896_v41 = vadd.f32 %v1895_v34, %v1875_v1  ;;  %2470 = vtanh.f32 %v1713_v28  ;;  %v1716_v21 = vpop.f32.mrb[44].mxu0  ;;  %v1946_v1 = vunpack.c.0.s8 %v1945_v33 }
 0x473   : > { %v2461_v57 = vpop.eup %2460  ;;  %v1917_v6 = vadd.f32 %v1916_v58, %v1876_v32  ;;  %v1717_v45 = vadd.f32 %v1716_v21, %v1559_v26  ;;  %v1718_v10 = vpop.f32.mrb[45].mxu0 }
 0x474   : > { %v2463_v46 = vpop.eup %2462  ;;  %v1877_v14 = vmul.f32 %v2461_v57, %v1833_v44  ;;  %v1719_v25 = vadd.f32 %v1718_v10, %v1559_v26  ;;  %v1848_v53 = vpop.permute.xlu0 %1847 }
 0x475   : > { %v1878_v47 = vmul.f32 %v2463_v46, %v1833_v44  ;;  %2472 = vtanh.f32 %v1717_v45  ;;  %v1949_v44 = vsub.s32 %v1946_v1, %v2868_v3 }
 0x476   : > { %v1897_v29 = vadd.f32 %v1896_v41, %v1877_v14  ;;  %2474 = vtanh.f32 %v1719_v25  ;;  %v1722_v23 = vpop.f32.mrb[46].mxu0 }
 0x477   : > { %v2465_v35 = vpop.eup %2464  ;;  %v1918_v49 = vadd.f32 %v1917_v6, %v1878_v47  ;;  %v1723_v39 = vadd.f32 %v1722_v23, %v1564_v15  ;;  %v1724_v51 = vpop.f32.mrb[47].mxu0 }
 0x478   : > { %v2467_v48 = vpop.eup %2466  ;;  %v1879_v30 = vmul.f32 %v2465_v35, %v1838_v43  ;;  %v1725_v52 = vadd.f32 %v1724_v51, %v1564_v15  ;;  %v1853_v15 = vpop.permute.xlu1 %1852 }
 0x479   : > { %v1880_v55 = vmul.f32 %v2467_v48, %v1838_v43  ;;  %2476 = vtanh.f32 %v1723_v39  ;;  %v1933_v58 = vpop.permute.xlu0 %1932 }
 0x47a   : > { %v1898_v56 = vadd.f32 %v1897_v29, %v1879_v30  ;;  %2478 = vtanh.f32 %v1725_v52  ;;  %v1938_v28 = vrot.slane %v1933_v58, %v2885_v9 }
 0x47b   : > { %v2469_v59 = vpop.eup %2468  ;;  %v1919_v26 = vadd.f32 %v1918_v49, %v1880_v55 }
 0x47c   : > { %v2471_v2 = vpop.eup %2470  ;;  %v1881_v60 = vmul.f32 %v2469_v59, %v1843_v50 }
 0x47d   : > { %v1882_v4 = vmul.f32 %v2471_v2, %v1843_v50 }
 0x47e   : > { %v1899_v61 = vadd.f32 %v1898_v56, %v1881_v60 }
 0x47f   : > { %v2473_v31 = vpop.eup %2472  ;;  %v1920_v8 = vadd.f32 %v1919_v26, %v1882_v4 }
 0x480   : > { %v2475_v11 = vpop.eup %2474  ;;  %v1883_v0 = vmul.f32 %v2473_v31, %v1848_v53 }
 0x481   : > { %v1884_v13 = vmul.f32 %v2475_v11, %v1848_v53 }
 0x482   : > { %v1900_v5 = vadd.f32 %v1899_v61, %v1883_v0 }
 0x483   : > { %v2477_v17 = vpop.eup %2476  ;;  %v1921_v18 = vadd.f32 %v1920_v8, %v1884_v13 }
 0x484   : > { %v2479_v16 = vpop.eup %2478  ;;  %v1885_v19 = vmul.f32 %v2477_v17, %v1853_v15 }
 0x485   : > { %v1886_v20 = vmul.f32 %v2479_v16, %v1853_v15 }
 0x486   : > { %v1901_v24 = vadd.f32 %v1900_v5, %v1885_v19 }
 0x487   : > { %v1922_v27 = vadd.f32 %v1921_v18, %v1886_v20 }
 0x488   : > { %v1902_v36 = vrot.slane %v1901_v24, 4 }
 0x489   : > { %v1923_v22 = vrot.slane %v1922_v27, 4 }
 0x48a   : > { %v1903_v37 = vadd.f32 %v1902_v36, %v1901_v24 }
 0x48b   : > { %v1924_v38 = vadd.f32 %v1923_v22, %v1922_v27 }
 0x48c   : > { %v1904_v7 = vrot.slane %v1903_v37, 2 }
 0x48d   : > { %v1925_v34 = vrot.slane %v1924_v38, 2 }
 0x48e   : > { %v1905_v40 = vadd.f32 %v1904_v7, %v1903_v37 }
 0x48f   : > { %v1926_v54 = vadd.f32 %v1925_v34, %v1924_v38 }
 0x490   : > { %v1906_v42 = vrot.slane %v1905_v40, 1 }
 0x491   : > { %v1927_v12 = vrot.slane %v1926_v54, 1 }
 0x492   : > { %v1907_v32 = vadd.f32 %v1906_v42, %v1905_v40 }
 0x493   : > { %v1928_v41 = vadd.f32 %v1927_v12, %v1926_v54 }
 0x494   : > { %v1939_v21 = vadd.f32 %v1938_v28, %v1907_v32 }
 0x495   : > { %v1940_v57 = vadd.f32 %v1938_v28, %v1928_v41 }
 0x497   : > { %v1943_v6 = vcombine.low %v1939_v21, %v1940_v57 }
 0x499   : > { %v1950_v45 = vrot.slane %v1943_v6, %v1949_v44 }
 0x49b   : > { %v1957_v10 = vrot.slane %v1950_v45, %v1949_v44 }
 0x49d   : > { %1963 = vst.msk [vmem:[%s382_s30] sm:$0x3] %vm1961_vm0, %v1957_v10 }
 0x49e   : > { %2493 = shalt.err (!%p2490_p3)
}
 0x49f   : > { %s2494_s23 = scalar_lea.hbm %s3402_s15, 32  ;;  %s2498_s13 = scalar_lea.hbm %s3455_s11, 64 }
 0x4a0   : > { %p2495_p4 = scmp.ne.s32.totalorder %s3402_s15, %s2494_s23  ;;  %p2499_p9 = scmp.lt.u32.totalorder %s3402_s15, %s3455_s11 }
 0x4a1   : > { %p2500_p10 = scmp.lt.u32.totalorder %s2498_s13, %s2494_s23  ;;  %p2502_p12 = scmp.lt.u32.totalorder %s2494_s23, %s3402_s15 }
 0x4a2   : > { %p2496_p7 = pnand %p2495_p4, %p2650_p5 }
 0x4a3   : > { %p2501_p11 = por %p2500_p10, %p2499_p9 }
 0x4a4   : > { %p2497_p8 = pneg %p2496_p7 }
 0x4a5   : > { %p2503_p13 = por %p2502_p12, %p2501_p11 }
 0x4a7   : > { %p2504_p0 = pnand %p2503_p13, %p2497_p8 }
 0x4a9   : > { %2507 = shalt.err (!%p2504_p0)
}
 0x4aa   : > { %2163 = dma.vmem_to_hbm [thread:$0]  (%p2650_p5), %s3404_s12, 32, %s3402_s15, %s1965_s16  }
 0x4ab PF: > { %p2169_p1 = scmp.ge.s32.totalorder %s2542_s22, 2  ;;  %s1991_s17 = sand.u32 1, %s2530_s19  }
 0x4ac   : > { %s1992_s18 = scalar_lea.sflag [#allocation4], %s1991_s17 }
 0x4ad   : > { %p2166_p2 = pnand %p2169_p1, %p2654_p6 }
 0x4af   : > { %2525 = dma.done.wait (!%p2166_p2), %s1992_s18, 32  }
 0x4b0   : > { %2527 = vsyncadd (!%p2166_p2), %s1992_s18, 4294967264  ;;  %p23_p3 = scmp.ge.s32.totalorder %s2637_s24, 4   ;;  %s3458_s19 = smov %s2534_s20 }
 0x4b1   : > { %s3459_s20 = smov %s2538_s21  ;;  %s3460_s21 = smov %s2648_s27 }
 0x4b2   : > { %s3461_s22 = smov %s2637_s24  ;;  %25 = sbr.rel (!%p23_p3) target bundleno = 6 (0x6), region = 99 }
 0x4b9   :  { %1997 = vsyncpa [#allocation4], 1 }
 0x4ba   :  { %1999 = vsyncpa [#allocation4 + $0x1], 1 }

</bundles_post_ra>
